<compile_context>
chip_gen: v7x
topology: tpu7x:2x2x1
jax: 0.10.0
libtpu: 0.0.40
codegen_flags: <defaults>
</compile_context>

<pallas_src>
import jax
import jax.numpy as jnp
from jax import lax
from jax.experimental import pallas as pl
from jax.experimental.pallas import tpu as pltpu


# -----------------------------------------------------------------------------
# Weight folding: (Cout, Cin, 3, 3) torch conv weight -> (4, 4, Cin, Cout)
# folded taps indexed by [parity = py*2+px, tap = a*2+b, Cin, Cout], where the
# source-pixel offset of tap (a, b) is dy = a-1 (py==0) / a (py==1), same for dx.
# -----------------------------------------------------------------------------
_GROUPS = (((0,), (1, 2)),    # even output row/col: off=-1 <- {k=0}, off=0 <- {k=1,2}
           ((0, 1), (2,)))    # odd  output row/col: off=0  <- {k=0,1}, off=+1 <- {k=2}


def _fold_weights(weight_oihw):
    c_out, c_in = weight_oihw.shape[0], weight_oihw.shape[1]
    w = jnp.transpose(weight_oihw, (2, 3, 1, 0))          # (ky, kx, Cin, Cout)
    taps = []
    for py in range(2):
        for px in range(2):
            for a in range(2):
                for b in range(2):
                    acc = jnp.zeros((c_in, c_out), w.dtype)
                    for ky in _GROUPS[py][a]:
                        for kx in _GROUPS[px][b]:
                            acc = acc + w[ky, kx]
                    taps.append(acc)
    return jnp.stack(taps, axis=0).reshape(4, 4, c_in, c_out)


def _pick_row_tile(H, W, C, itemsize, budget_bytes=12 * 1024 * 1024):
    """Largest divisor of H whose double-buffered tile working set fits the budget
    (conservative so the default scoped VMEM works on v5e/v6e and v7x's 64 MiB)."""
    best = 1
    for th in range(1, H + 1):
        if H % th:
            continue
        est = (2 * (th + 2) * W * C * itemsize      # input tile + halo rows (2 pipeline bufs)
               + 2 * 4 * th * W * C * itemsize      # 4-parity output tile   (2 pipeline bufs)
               + th * W * C * 4)                    # f32 accumulator scratch
        if est <= budget_bytes:
            best = th
    return best


# -----------------------------------------------------------------------------
# Fused kernel: nearest 2x upsample + 3x3 "same" conv on one row tile.
# -----------------------------------------------------------------------------
def _upsample_conv_kernel(x_ref, top_ref, bot_ref, w_ref, b_ref, o_ref, acc_ref):
    # x_ref  : (1, TH, W, C)   source rows [i*TH, i*TH+TH)
    # top_ref: (1, 1,  W, C)   source row  i*TH - 1    (garbage when i == 0)
    # bot_ref: (1, 1,  W, C)   source row  i*TH + TH   (garbage when i == last)
    # w_ref  : (4, 4, C, C)    folded weights [py*2+px, a*2+b, Cin, Cout]
    # b_ref  : (1, C)
    # o_ref  : (4, TH, W, C)   parity-separated output (o_ref[py*2+px])
    # acc_ref: (TH*W, C) f32   accumulator scratch
    i = pl.program_id(1)
    last = pl.num_programs(1) - 1
    _, TH, W, C = x_ref.shape

    x = x_ref[0]                                                 # (TH, W, C)
    zero_row = jnp.zeros((1, W, C), x.dtype)
    top = jnp.where(i == 0, zero_row, top_ref[0])                # zero halo at image top
    bot = jnp.where(i == last, zero_row, bot_ref[0])             # zero halo at image bottom
    slab = jnp.concatenate([top, x, bot], axis=0)                # (TH+2, W, C)

    # Column-shifted copies: value of source col ox-1 / ox+1 at position ox,
    # zero at the left/right border (built once per tile, not per tap).
    zero_col = jnp.zeros((TH + 2, 1, C), x.dtype)
    slab_m = jnp.concatenate([zero_col, slab[:, :W - 1, :]], axis=1)   # dx = -1
    slab_p = jnp.concatenate([slab[:, 1:, :], zero_col], axis=1)       # dx = +1
    slabs = (slab_m, slab, slab_p)                                     # index by dx + 1

    bias = jnp.broadcast_to(b_ref[...].astype(jnp.float32), acc_ref.shape)

    for py in range(2):
        for px in range(2):
            acc_ref[...] = bias
            for a in range(2):
                dy = a - 1 if py == 0 else a          # py=0 -> {-1, 0}; py=1 -> {0, +1}
                for b in range(2):
                    dx = b - 1 if px == 0 else b
                    strip = slabs[dx + 1][dy + 1:dy + 1 + TH].reshape(TH * W, C)
                    acc_ref[...] += jnp.dot(strip, w_ref[py * 2 + px, a * 2 + b],
                                            preferred_element_type=jnp.float32)
            o_ref[py * 2 + px] = acc_ref[...].reshape(TH, W, C).astype(o_ref.dtype)


def upsample2x_conv3x3(x_nhwc, wf, bias_1c, *, block_rows=None):
    N, H, W, C = x_nhwc.shape
    th = (block_rows if block_rows is not None
          else _pick_row_tile(H, W, C, x_nhwc.dtype.itemsize))
    assert H % th == 0, (H, th)
    return pl.pallas_call(
        _upsample_conv_kernel,
        out_shape=jax.ShapeDtypeStruct((N * 4, H, W, C), x_nhwc.dtype),
        grid=(N, H // th),
        in_specs=[
            pl.BlockSpec((1, th, W, C), lambda n, i: (n, i, 0, 0)),
            pl.BlockSpec((1, 1, W, C),
                         lambda n, i: (n, jnp.maximum(i * th - 1, 0), 0, 0)),
            pl.BlockSpec((1, 1, W, C),
                         lambda n, i: (n, jnp.minimum(i * th + th, H - 1), 0, 0)),
            # Constant index_map: weights/bias are fetched once and stay resident.
            # TODO(synk): single-buffer them (pipeline_mode=pl.Buffered(1)) for very large C.
            pl.BlockSpec((4, 4, C, C), lambda n, i: (0, 0, 0, 0)),
            pl.BlockSpec((1, C), lambda n, i: (0, 0)),
        ],
        out_specs=pl.BlockSpec((4, th, W, C), lambda n, i: (n, i, 0, 0)),
        scratch_shapes=[pltpu.VMEM((th * W, C), jnp.float32)],
        compiler_params=pltpu.CompilerParams(
            dimension_semantics=("parallel", "parallel"),
            vmem_limit_bytes=48 * 1024 * 1024),
    )(x_nhwc, x_nhwc, x_nhwc, wf, bias_1c)


# -----------------------------------------------------------------------------
# Plain nearest 2x upsample (with_conv=False): same parity-separated output.
# -----------------------------------------------------------------------------
def _upsample_kernel(x_ref, o_ref):
    v = x_ref[0]                                  # (TH, W, C)
    for p in range(4):
        o_ref[p] = v


def upsample2x(x_nhwc, *, block_rows=None):
    N, H, W, C = x_nhwc.shape
    th = (block_rows if block_rows is not None
          else _pick_row_tile(H, W, C, x_nhwc.dtype.itemsize))
    assert H % th == 0, (H, th)
    return pl.pallas_call(
        _upsample_kernel,
        out_shape=jax.ShapeDtypeStruct((N * 4, H, W, C), x_nhwc.dtype),
        grid=(N, H // th),
        in_specs=[pl.BlockSpec((1, th, W, C), lambda n, i: (n, i, 0, 0))],
        out_specs=pl.BlockSpec((4, th, W, C), lambda n, i: (n, i, 0, 0)),
        compiler_params=pltpu.CompilerParams(
            dimension_semantics=("parallel", "parallel")),
    )(x_nhwc)


# -----------------------------------------------------------------------------
# Module wrapper (parameters + layout glue in plain JAX)
# -----------------------------------------------------------------------------
class UpsamplePallas:
    """Pallas port of Upsample(in_channels, with_conv)."""

    def __init__(self, in_channels: int, with_conv: bool, key):
        self.with_conv = with_conv
        if with_conv:
            kw, kb = jax.random.split(key)
            bound = 1.0 / (in_channels * 9) ** 0.5
            # PyTorch Conv2d weight layout: (Cout, Cin, kH, kW)
            self.weight = jax.random.uniform(
                kw, (in_channels, in_channels, 3, 3), jnp.float32, -bound, bound)
            self.bias = jax.random.uniform(
                kb, (in_channels,), jnp.float32, -bound, bound)

    def __call__(self, x_nchw, *, block_rows=None):
        N, C, H, W = x_nchw.shape
        x = jnp.transpose(x_nchw, (0, 2, 3, 1))                  # NCHW -> NHWC glue
        if self.with_conv:
            y = upsample2x_conv3x3(x, _fold_weights(self.weight),
                                   self.bias.reshape(1, C), block_rows=block_rows)
        else:
            y = upsample2x(x, block_rows=block_rows)
        # Parity-separated (N*4, H, W, C) -> NCHW (N, C, 2H, 2W). The reshapes are
        # free; the single transpose is the NHWC->NCHW glue we need anyway.
        y = y.reshape(N, 2, 2, H, W, C)                          # (n, py, px, h, w, c)
        y = jnp.transpose(y, (0, 5, 3, 1, 4, 2))                 # (n, c, h, py, w, px)
        return y.reshape(N, C, 2 * H, 2 * W)


def _reference(x_nchw, weight, bias):
    up = jnp.repeat(jnp.repeat(x_nchw, 2, axis=2), 2, axis=3)
    y = lax.conv_general_dilated(
        up, weight, window_strides=(1, 1), padding=((1, 1), (1, 1)),
        dimension_numbers=("NCHW", "OIHW", "NCHW"))
    return y + bias[None, :, None, None]


if __name__ == "__main__":
    key = jax.random.PRNGKey(0)
    k_x, k_params = jax.random.split(key)

    N, C, H, W = 2, 4, 16, 16
    x = jax.random.normal(k_x, (N, C, H, W), jnp.float32)

    module = UpsamplePallas(in_channels=C, with_conv=True, key=k_params)
    ref = jax.block_until_ready(_reference(x, module.weight, module.bias))

    # Multi-tile path (exercises top / interior / bottom halo handling).
    out = jax.block_until_ready(module(x, block_rows=4))
    assert out.shape == (N, C, 2 * H, 2 * W), out.shape
    assert jnp.allclose(out, ref, rtol=1e-4, atol=1e-4), \
        float(jnp.max(jnp.abs(out - ref)))

    # Default (auto-picked) row tile.
    out2 = jax.block_until_ready(module(x))
    assert jnp.allclose(out2, ref, rtol=1e-4, atol=1e-4), \
        float(jnp.max(jnp.abs(out2 - ref)))

    # with_conv=False path.
    module_nc = UpsamplePallas(in_channels=C, with_conv=False, key=k_params)
    up = jax.block_until_ready(module_nc(x))
    ref_up = jnp.repeat(jnp.repeat(x, 2, axis=2), 2, axis=3)
    assert jnp.allclose(up, ref_up), float(jnp.max(jnp.abs(up - ref_up)))

    print("KERNEL_OK")
</pallas_src>

<mosaic_0001>
module attributes {stable_mosaic.version = 11 : i64} {
  func.func @_upsample_conv_kernel(%arg0: i32, %arg1: i32, %arg2: memref<1x4x16x4xf32, #tpu.memory_space<vmem>>, %arg3: memref<1x1x16x4xf32, #tpu.memory_space<vmem>>, %arg4: memref<1x1x16x4xf32, #tpu.memory_space<vmem>>, %arg5: memref<4x4x4x4xf32, #tpu.memory_space<vmem>>, %arg6: memref<1x4xf32, #tpu.memory_space<vmem>>, %arg7: memref<4x4x16x4xf32, #tpu.memory_space<vmem>>, %arg8: memref<64x4xf32, #tpu.memory_space<vmem>>) attributes {dimension_semantics = [#tpu.dimension_semantics<parallel>, #tpu.dimension_semantics<parallel>], iteration_bounds = array<i64: 2, 4>, scalar_prefetch = 0 : i64, scratch_operands = 1 : i64, tpu.core_type = #tpu.core_type<tc>, window_params = [{transform_indices = @transform_0, window_bounds = array<i64: 1, 4, 16, 4>}, {transform_indices = @transform_1, window_bounds = array<i64: 1, 1, 16, 4>}, {transform_indices = @transform_2, window_bounds = array<i64: 1, 1, 16, 4>}, {pipeline_mode = #tpu.pipeline_mode<synchronous>, transform_indices = @transform_3, window_bounds = array<i64: 4, 4, 4, 4>}, {pipeline_mode = #tpu.pipeline_mode<synchronous>, transform_indices = @transform_4, window_bounds = array<i64: 1, 4>}, {transform_indices = @transform_5, window_bounds = array<i64: 4, 4, 16, 4>}]} {
    %c0 = arith.constant 0 : index
    %c0_0 = arith.constant 0 : index
    %c0_1 = arith.constant 0 : index
    %c0_2 = arith.constant 0 : index
    %0 = vector.load %arg2[%c0, %c0_0, %c0_1, %c0_2] : memref<1x4x16x4xf32, #tpu.memory_space<vmem>>, vector<1x4x16x4xf32>
    %1 = vector.shape_cast %0 : vector<1x4x16x4xf32> to vector<4x16x4xf32>
    %cst = arith.constant 0.000000e+00 : f32
    %2 = vector.broadcast %cst : f32 to vector<1x16x4xf32>
    %c0_i32 = arith.constant 0 : i32
    %3 = arith.cmpi eq, %arg1, %c0_i32 : i32
    %c0_3 = arith.constant 0 : index
    %c0_4 = arith.constant 0 : index
    %c0_5 = arith.constant 0 : index
    %c0_6 = arith.constant 0 : index
    %4 = vector.load %arg3[%c0_3, %c0_4, %c0_5, %c0_6] : memref<1x1x16x4xf32, #tpu.memory_space<vmem>>, vector<1x1x16x4xf32>
    %5 = vector.shape_cast %4 : vector<1x1x16x4xf32> to vector<1x16x4xf32>
    %6 = arith.select %3, %2, %5 : vector<1x16x4xf32>
    %c3_i32 = arith.constant 3 : i32
    %7 = arith.cmpi eq, %arg1, %c3_i32 : i32
    %c0_7 = arith.constant 0 : index
    %c0_8 = arith.constant 0 : index
    %c0_9 = arith.constant 0 : index
    %c0_10 = arith.constant 0 : index
    %8 = vector.load %arg4[%c0_7, %c0_8, %c0_9, %c0_10] : memref<1x1x16x4xf32, #tpu.memory_space<vmem>>, vector<1x1x16x4xf32>
    %9 = vector.shape_cast %8 : vector<1x1x16x4xf32> to vector<1x16x4xf32>
    %10 = arith.select %7, %2, %9 : vector<1x16x4xf32>
    %11 = tpu.concatenate %6, %1, %10 in 0 : vector<1x16x4xf32>, vector<4x16x4xf32>, vector<1x16x4xf32> -> vector<6x16x4xf32>
    %cst_11 = arith.constant 0.000000e+00 : f32
    %12 = vector.broadcast %cst_11 : f32 to vector<6x1x4xf32>
    %13 = vector.extract_strided_slice %11 {offsets = [0, 0, 0], sizes = [6, 15, 4], strides = [1, 1, 1]} : vector<6x16x4xf32> to vector<6x15x4xf32>
    %14 = tpu.concatenate %12, %13 in 1 : vector<6x1x4xf32>, vector<6x15x4xf32> -> vector<6x16x4xf32>
    %15 = vector.extract_strided_slice %11 {offsets = [0, 1, 0], sizes = [6, 15, 4], strides = [1, 1, 1]} : vector<6x16x4xf32> to vector<6x15x4xf32>
    %16 = tpu.concatenate %15, %12 in 1 : vector<6x15x4xf32>, vector<6x1x4xf32> -> vector<6x16x4xf32>
    %c0_12 = arith.constant 0 : index
    %c0_13 = arith.constant 0 : index
    %17 = vector.load %arg6[%c0_12, %c0_13] : memref<1x4xf32, #tpu.memory_space<vmem>>, vector<1x4xf32>
    %18 = vector.shape_cast %17 : vector<1x4xf32> to vector<1x4xf32>
    %19 = vector.broadcast %18 : vector<1x4xf32> to vector<64x4xf32>
    %c0_14 = arith.constant 0 : index
    %c0_15 = arith.constant 0 : index
    %20 = vector.load %arg8[%c0_14, %c0_15] : memref<64x4xf32, #tpu.memory_space<vmem>>, vector<64x4xf32>
    tpu.vector_store %arg8[%c0_14, %c0_15], %19 {strides = array<i32>} : memref<64x4xf32, #tpu.memory_space<vmem>>, vector<64x4xf32>,
    %21 = vector.extract_strided_slice %14 {offsets = [0, 0, 0], sizes = [4, 16, 4], strides = [1, 1, 1]} : vector<6x16x4xf32> to vector<4x16x4xf32>
    %22 = vector.shape_cast %21 : vector<4x16x4xf32> to vector<64x4xf32>
    %c0_16 = arith.constant 0 : index
    %c0_17 = arith.constant 0 : index
    %23 = vector.load %arg8[%c0_16, %c0_17] : memref<64x4xf32, #tpu.memory_space<vmem>>, vector<64x4xf32>
    %c0_18 = arith.constant 0 : index
    %c0_19 = arith.constant 0 : index
    %c0_20 = arith.constant 0 : index
    %c0_21 = arith.constant 0 : index
    %24 = vector.load %arg5[%c0_18, %c0_19, %c0_20, %c0_21] : memref<4x4x4x4xf32, #tpu.memory_space<vmem>>, vector<1x1x4x4xf32>
    %25 = vector.shape_cast %24 : vector<1x1x4x4xf32> to vector<4x4xf32>
    %cst_22 = arith.constant dense<0.000000e+00> : vector<64x4xf32>
    %26 = tpu.matmul %22, %25, %cst_22 {dimension_numbers = #tpu.dot_dimension_numbers<[1], [0], [0], [1], [0, 0, 1, 1], [], []>} : vector<64x4xf32>, vector<4x4xf32>, vector<64x4xf32> -> vector<64x4xf32>
    %27 = arith.addf %23, %26 : vector<64x4xf32>
    %c0_23 = arith.constant 0 : index
    %c0_24 = arith.constant 0 : index
    %28 = vector.load %arg8[%c0_23, %c0_24] : memref<64x4xf32, #tpu.memory_space<vmem>>, vector<64x4xf32>
    tpu.vector_store %arg8[%c0_23, %c0_24], %27 {strides = array<i32>} : memref<64x4xf32, #tpu.memory_space<vmem>>, vector<64x4xf32>,
    %29 = vector.extract_strided_slice %11 {offsets = [0, 0, 0], sizes = [4, 16, 4], strides = [1, 1, 1]} : vector<6x16x4xf32> to vector<4x16x4xf32>
    %30 = vector.shape_cast %29 : vector<4x16x4xf32> to vector<64x4xf32>
    %c0_25 = arith.constant 0 : index
    %c0_26 = arith.constant 0 : index
    %31 = vector.load %arg8[%c0_25, %c0_26] : memref<64x4xf32, #tpu.memory_space<vmem>>, vector<64x4xf32>
    %c0_27 = arith.constant 0 : index
    %c1 = arith.constant 1 : index
    %c0_28 = arith.constant 0 : index
    %c0_29 = arith.constant 0 : index
    %32 = vector.load %arg5[%c0_27, %c1, %c0_28, %c0_29] : memref<4x4x4x4xf32, #tpu.memory_space<vmem>>, vector<1x1x4x4xf32>
    %33 = vector.shape_cast %32 : vector<1x1x4x4xf32> to vector<4x4xf32>
    %cst_30 = arith.constant dense<0.000000e+00> : vector<64x4xf32>
    %34 = tpu.matmul %30, %33, %cst_30 {dimension_numbers = #tpu.dot_dimension_numbers<[1], [0], [0], [1], [0, 0, 1, 1], [], []>} : vector<64x4xf32>, vector<4x4xf32>, vector<64x4xf32> -> vector<64x4xf32>
    %35 = arith.addf %31, %34 : vector<64x4xf32>
    %c0_31 = arith.constant 0 : index
    %c0_32 = arith.constant 0 : index
    %36 = vector.load %arg8[%c0_31, %c0_32] : memref<64x4xf32, #tpu.memory_space<vmem>>, vector<64x4xf32>
    tpu.vector_store %arg8[%c0_31, %c0_32], %35 {strides = array<i32>} : memref<64x4xf32, #tpu.memory_space<vmem>>, vector<64x4xf32>,
    %37 = vector.extract_strided_slice %14 {offsets = [1, 0, 0], sizes = [4, 16, 4], strides = [1, 1, 1]} : vector<6x16x4xf32> to vector<4x16x4xf32>
    %38 = vector.shape_cast %37 : vector<4x16x4xf32> to vector<64x4xf32>
    %c0_33 = arith.constant 0 : index
    %c0_34 = arith.constant 0 : index
    %39 = vector.load %arg8[%c0_33, %c0_34] : memref<64x4xf32, #tpu.memory_space<vmem>>, vector<64x4xf32>
    %c0_35 = arith.constant 0 : index
    %c2 = arith.constant 2 : index
    %c0_36 = arith.constant 0 : index
    %c0_37 = arith.constant 0 : index
    %40 = vector.load %arg5[%c0_35, %c2, %c0_36, %c0_37] : memref<4x4x4x4xf32, #tpu.memory_space<vmem>>, vector<1x1x4x4xf32>
    %41 = vector.shape_cast %40 : vector<1x1x4x4xf32> to vector<4x4xf32>
    %cst_38 = arith.constant dense<0.000000e+00> : vector<64x4xf32>
    %42 = tpu.matmul %38, %41, %cst_38 {dimension_numbers = #tpu.dot_dimension_numbers<[1], [0], [0], [1], [0, 0, 1, 1], [], []>} : vector<64x4xf32>, vector<4x4xf32>, vector<64x4xf32> -> vector<64x4xf32>
    %43 = arith.addf %39, %42 : vector<64x4xf32>
    %c0_39 = arith.constant 0 : index
    %c0_40 = arith.constant 0 : index
    %44 = vector.load %arg8[%c0_39, %c0_40] : memref<64x4xf32, #tpu.memory_space<vmem>>, vector<64x4xf32>
    tpu.vector_store %arg8[%c0_39, %c0_40], %43 {strides = array<i32>} : memref<64x4xf32, #tpu.memory_space<vmem>>, vector<64x4xf32>,
    %45 = vector.extract_strided_slice %11 {offsets = [1, 0, 0], sizes = [4, 16, 4], strides = [1, 1, 1]} : vector<6x16x4xf32> to vector<4x16x4xf32>
    %46 = vector.shape_cast %45 : vector<4x16x4xf32> to vector<64x4xf32>
    %c0_41 = arith.constant 0 : index
    %c0_42 = arith.constant 0 : index
    %47 = vector.load %arg8[%c0_41, %c0_42] : memref<64x4xf32, #tpu.memory_space<vmem>>, vector<64x4xf32>
    %c0_43 = arith.constant 0 : index
    %c3 = arith.constant 3 : index
    %c0_44 = arith.constant 0 : index
    %c0_45 = arith.constant 0 : index
    %48 = vector.load %arg5[%c0_43, %c3, %c0_44, %c0_45] : memref<4x4x4x4xf32, #tpu.memory_space<vmem>>, vector<1x1x4x4xf32>
    %49 = vector.shape_cast %48 : vector<1x1x4x4xf32> to vector<4x4xf32>
    %cst_46 = arith.constant dense<0.000000e+00> : vector<64x4xf32>
    %50 = tpu.matmul %46, %49, %cst_46 {dimension_numbers = #tpu.dot_dimension_numbers<[1], [0], [0], [1], [0, 0, 1, 1], [], []>} : vector<64x4xf32>, vector<4x4xf32>, vector<64x4xf32> -> vector<64x4xf32>
    %51 = arith.addf %47, %50 : vector<64x4xf32>
    %c0_47 = arith.constant 0 : index
    %c0_48 = arith.constant 0 : index
    %52 = vector.load %arg8[%c0_47, %c0_48] : memref<64x4xf32, #tpu.memory_space<vmem>>, vector<64x4xf32>
    tpu.vector_store %arg8[%c0_47, %c0_48], %51 {strides = array<i32>} : memref<64x4xf32, #tpu.memory_space<vmem>>, vector<64x4xf32>,
    %c0_49 = arith.constant 0 : index
    %c0_50 = arith.constant 0 : index
    %53 = vector.load %arg8[%c0_49, %c0_50] : memref<64x4xf32, #tpu.memory_space<vmem>>, vector<64x4xf32>
    %54 = vector.shape_cast %53 : vector<64x4xf32> to vector<4x16x4xf32>
    %c0_51 = arith.constant 0 : index
    %c0_52 = arith.constant 0 : index
    %c0_53 = arith.constant 0 : index
    %c0_54 = arith.constant 0 : index
    %55 = vector.load %arg7[%c0_51, %c0_52, %c0_53, %c0_54] : memref<4x4x16x4xf32, #tpu.memory_space<vmem>>, vector<1x4x16x4xf32>
    %56 = vector.shape_cast %55 : vector<1x4x16x4xf32> to vector<4x16x4xf32>
    %57 = vector.shape_cast %54 : vector<4x16x4xf32> to vector<1x4x16x4xf32>
    tpu.vector_store %arg7[%c0_51, %c0_52, %c0_53, %c0_54], %57 {strides = array<i32>} : memref<4x4x16x4xf32, #tpu.memory_space<vmem>>, vector<1x4x16x4xf32>,
    %c0_55 = arith.constant 0 : index
    %c0_56 = arith.constant 0 : index
    %58 = vector.load %arg8[%c0_55, %c0_56] : memref<64x4xf32, #tpu.memory_space<vmem>>, vector<64x4xf32>
    tpu.vector_store %arg8[%c0_55, %c0_56], %19 {strides = array<i32>} : memref<64x4xf32, #tpu.memory_space<vmem>>, vector<64x4xf32>,
    %59 = vector.extract_strided_slice %11 {offsets = [0, 0, 0], sizes = [4, 16, 4], strides = [1, 1, 1]} : vector<6x16x4xf32> to vector<4x16x4xf32>
    %60 = vector.shape_cast %59 : vector<4x16x4xf32> to vector<64x4xf32>
    %c0_57 = arith.constant 0 : index
    %c0_58 = arith.constant 0 : index
    %61 = vector.load %arg8[%c0_57, %c0_58] : memref<64x4xf32, #tpu.memory_space<vmem>>, vector<64x4xf32>
    %c1_59 = arith.constant 1 : index
    %c0_60 = arith.constant 0 : index
    %c0_61 = arith.constant 0 : index
    %c0_62 = arith.constant 0 : index
    %62 = vector.load %arg5[%c1_59, %c0_60, %c0_61, %c0_62] : memref<4x4x4x4xf32, #tpu.memory_space<vmem>>, vector<1x1x4x4xf32>
    %63 = vector.shape_cast %62 : vector<1x1x4x4xf32> to vector<4x4xf32>
    %cst_63 = arith.constant dense<0.000000e+00> : vector<64x4xf32>
    %64 = tpu.matmul %60, %63, %cst_63 {dimension_numbers = #tpu.dot_dimension_numbers<[1], [0], [0], [1], [0, 0, 1, 1], [], []>} : vector<64x4xf32>, vector<4x4xf32>, vector<64x4xf32> -> vector<64x4xf32>
    %65 = arith.addf %61, %64 : vector<64x4xf32>
    %c0_64 = arith.constant 0 : index
    %c0_65 = arith.constant 0 : index
    %66 = vector.load %arg8[%c0_64, %c0_65] : memref<64x4xf32, #tpu.memory_space<vmem>>, vector<64x4xf32>
    tpu.vector_store %arg8[%c0_64, %c0_65], %65 {strides = array<i32>} : memref<64x4xf32, #tpu.memory_space<vmem>>, vector<64x4xf32>,
    %67 = vector.extract_strided_slice %16 {offsets = [0, 0, 0], sizes = [4, 16, 4], strides = [1, 1, 1]} : vector<6x16x4xf32> to vector<4x16x4xf32>
    %68 = vector.shape_cast %67 : vector<4x16x4xf32> to vector<64x4xf32>
    %c0_66 = arith.constant 0 : index
    %c0_67 = arith.constant 0 : index
    %69 = vector.load %arg8[%c0_66, %c0_67] : memref<64x4xf32, #tpu.memory_space<vmem>>, vector<64x4xf32>
    %c1_68 = arith.constant 1 : index
    %c1_69 = arith.constant 1 : index
    %c0_70 = arith.constant 0 : index
    %c0_71 = arith.constant 0 : index
    %70 = vector.load %arg5[%c1_68, %c1_69, %c0_70, %c0_71] : memref<4x4x4x4xf32, #tpu.memory_space<vmem>>, vector<1x1x4x4xf32>
    %71 = vector.shape_cast %70 : vector<1x1x4x4xf32> to vector<4x4xf32>
    %cst_72 = arith.constant dense<0.000000e+00> : vector<64x4xf32>
    %72 = tpu.matmul %68, %71, %cst_72 {dimension_numbers = #tpu.dot_dimension_numbers<[1], [0], [0], [1], [0, 0, 1, 1], [], []>} : vector<64x4xf32>, vector<4x4xf32>, vector<64x4xf32> -> vector<64x4xf32>
    %73 = arith.addf %69, %72 : vector<64x4xf32>
    %c0_73 = arith.constant 0 : index
    %c0_74 = arith.constant 0 : index
    %74 = vector.load %arg8[%c0_73, %c0_74] : memref<64x4xf32, #tpu.memory_space<vmem>>, vector<64x4xf32>
    tpu.vector_store %arg8[%c0_73, %c0_74], %73 {strides = array<i32>} : memref<64x4xf32, #tpu.memory_space<vmem>>, vector<64x4xf32>,
    %75 = vector.extract_strided_slice %11 {offsets = [1, 0, 0], sizes = [4, 16, 4], strides = [1, 1, 1]} : vector<6x16x4xf32> to vector<4x16x4xf32>
    %76 = vector.shape_cast %75 : vector<4x16x4xf32> to vector<64x4xf32>
    %c0_75 = arith.constant 0 : index
    %c0_76 = arith.constant 0 : index
    %77 = vector.load %arg8[%c0_75, %c0_76] : memref<64x4xf32, #tpu.memory_space<vmem>>, vector<64x4xf32>
    %c1_77 = arith.constant 1 : index
    %c2_78 = arith.constant 2 : index
    %c0_79 = arith.constant 0 : index
    %c0_80 = arith.constant 0 : index
    %78 = vector.load %arg5[%c1_77, %c2_78, %c0_79, %c0_80] : memref<4x4x4x4xf32, #tpu.memory_space<vmem>>, vector<1x1x4x4xf32>
    %79 = vector.shape_cast %78 : vector<1x1x4x4xf32> to vector<4x4xf32>
    %cst_81 = arith.constant dense<0.000000e+00> : vector<64x4xf32>
    %80 = tpu.matmul %76, %79, %cst_81 {dimension_numbers = #tpu.dot_dimension_numbers<[1], [0], [0], [1], [0, 0, 1, 1], [], []>} : vector<64x4xf32>, vector<4x4xf32>, vector<64x4xf32> -> vector<64x4xf32>
    %81 = arith.addf %77, %80 : vector<64x4xf32>
    %c0_82 = arith.constant 0 : index
    %c0_83 = arith.constant 0 : index
    %82 = vector.load %arg8[%c0_82, %c0_83] : memref<64x4xf32, #tpu.memory_space<vmem>>, vector<64x4xf32>
    tpu.vector_store %arg8[%c0_82, %c0_83], %81 {strides = array<i32>} : memref<64x4xf32, #tpu.memory_space<vmem>>, vector<64x4xf32>,
    %83 = vector.extract_strided_slice %16 {offsets = [1, 0, 0], sizes = [4, 16, 4], strides = [1, 1, 1]} : vector<6x16x4xf32> to vector<4x16x4xf32>
    %84 = vector.shape_cast %83 : vector<4x16x4xf32> to vector<64x4xf32>
    %c0_84 = arith.constant 0 : index
    %c0_85 = arith.constant 0 : index
    %85 = vector.load %arg8[%c0_84, %c0_85] : memref<64x4xf32, #tpu.memory_space<vmem>>, vector<64x4xf32>
    %c1_86 = arith.constant 1 : index
    %c3_87 = arith.constant 3 : index
    %c0_88 = arith.constant 0 : index
    %c0_89 = arith.constant 0 : index
    %86 = vector.load %arg5[%c1_86, %c3_87, %c0_88, %c0_89] : memref<4x4x4x4xf32, #tpu.memory_space<vmem>>, vector<1x1x4x4xf32>
    %87 = vector.shape_cast %86 : vector<1x1x4x4xf32> to vector<4x4xf32>
    %cst_90 = arith.constant dense<0.000000e+00> : vector<64x4xf32>
    %88 = tpu.matmul %84, %87, %cst_90 {dimension_numbers = #tpu.dot_dimension_numbers<[1], [0], [0], [1], [0, 0, 1, 1], [], []>} : vector<64x4xf32>, vector<4x4xf32>, vector<64x4xf32> -> vector<64x4xf32>
    %89 = arith.addf %85, %88 : vector<64x4xf32>
    %c0_91 = arith.constant 0 : index
    %c0_92 = arith.constant 0 : index
    %90 = vector.load %arg8[%c0_91, %c0_92] : memref<64x4xf32, #tpu.memory_space<vmem>>, vector<64x4xf32>
    tpu.vector_store %arg8[%c0_91, %c0_92], %89 {strides = array<i32>} : memref<64x4xf32, #tpu.memory_space<vmem>>, vector<64x4xf32>,
    %c0_93 = arith.constant 0 : index
    %c0_94 = arith.constant 0 : index
    %91 = vector.load %arg8[%c0_93, %c0_94] : memref<64x4xf32, #tpu.memory_space<vmem>>, vector<64x4xf32>
    %92 = vector.shape_cast %91 : vector<64x4xf32> to vector<4x16x4xf32>
    %c1_95 = arith.constant 1 : index
    %c0_96 = arith.constant 0 : index
    %c0_97 = arith.constant 0 : index
    %c0_98 = arith.constant 0 : index
    %93 = vector.load %arg7[%c1_95, %c0_96, %c0_97, %c0_98] : memref<4x4x16x4xf32, #tpu.memory_space<vmem>>, vector<1x4x16x4xf32>
    %94 = vector.shape_cast %93 : vector<1x4x16x4xf32> to vector<4x16x4xf32>
    %95 = vector.shape_cast %92 : vector<4x16x4xf32> to vector<1x4x16x4xf32>
    tpu.vector_store %arg7[%c1_95, %c0_96, %c0_97, %c0_98], %95 {strides = array<i32>} : memref<4x4x16x4xf32, #tpu.memory_space<vmem>>, vector<1x4x16x4xf32>,
    %c0_99 = arith.constant 0 : index
    %c0_100 = arith.constant 0 : index
    %96 = vector.load %arg8[%c0_99, %c0_100] : memref<64x4xf32, #tpu.memory_space<vmem>>, vector<64x4xf32>
    tpu.vector_store %arg8[%c0_99, %c0_100], %19 {strides = array<i32>} : memref<64x4xf32, #tpu.memory_space<vmem>>, vector<64x4xf32>,
    %97 = vector.extract_strided_slice %14 {offsets = [1, 0, 0], sizes = [4, 16, 4], strides = [1, 1, 1]} : vector<6x16x4xf32> to vector<4x16x4xf32>
    %98 = vector.shape_cast %97 : vector<4x16x4xf32> to vector<64x4xf32>
    %c0_101 = arith.constant 0 : index
    %c0_102 = arith.constant 0 : index
    %99 = vector.load %arg8[%c0_101, %c0_102] : memref<64x4xf32, #tpu.memory_space<vmem>>, vector<64x4xf32>
    %c2_103 = arith.constant 2 : index
    %c0_104 = arith.constant 0 : index
    %c0_105 = arith.constant 0 : index
    %c0_106 = arith.constant 0 : index
    %100 = vector.load %arg5[%c2_103, %c0_104, %c0_105, %c0_106] : memref<4x4x4x4xf32, #tpu.memory_space<vmem>>, vector<1x1x4x4xf32>
    %101 = vector.shape_cast %100 : vector<1x1x4x4xf32> to vector<4x4xf32>
    %cst_107 = arith.constant dense<0.000000e+00> : vector<64x4xf32>
    %102 = tpu.matmul %98, %101, %cst_107 {dimension_numbers = #tpu.dot_dimension_numbers<[1], [0], [0], [1], [0, 0, 1, 1], [], []>} : vector<64x4xf32>, vector<4x4xf32>, vector<64x4xf32> -> vector<64x4xf32>
    %103 = arith.addf %99, %102 : vector<64x4xf32>
    %c0_108 = arith.constant 0 : index
    %c0_109 = arith.constant 0 : index
    %104 = vector.load %arg8[%c0_108, %c0_109] : memref<64x4xf32, #tpu.memory_space<vmem>>, vector<64x4xf32>
    tpu.vector_store %arg8[%c0_108, %c0_109], %103 {strides = array<i32>} : memref<64x4xf32, #tpu.memory_space<vmem>>, vector<64x4xf32>,
    %105 = vector.extract_strided_slice %11 {offsets = [1, 0, 0], sizes = [4, 16, 4], strides = [1, 1, 1]} : vector<6x16x4xf32> to vector<4x16x4xf32>
    %106 = vector.shape_cast %105 : vector<4x16x4xf32> to vector<64x4xf32>
    %c0_110 = arith.constant 0 : index
    %c0_111 = arith.constant 0 : index
    %107 = vector.load %arg8[%c0_110, %c0_111] : memref<64x4xf32, #tpu.memory_space<vmem>>, vector<64x4xf32>
    %c2_112 = arith.constant 2 : index
    %c1_113 = arith.constant 1 : index
    %c0_114 = arith.constant 0 : index
    %c0_115 = arith.constant 0 : index
    %108 = vector.load %arg5[%c2_112, %c1_113, %c0_114, %c0_115] : memref<4x4x4x4xf32, #tpu.memory_space<vmem>>, vector<1x1x4x4xf32>
    %109 = vector.shape_cast %108 : vector<1x1x4x4xf32> to vector<4x4xf32>
    %cst_116 = arith.constant dense<0.000000e+00> : vector<64x4xf32>
    %110 = tpu.matmul %106, %109, %cst_116 {dimension_numbers = #tpu.dot_dimension_numbers<[1], [0], [0], [1], [0, 0, 1, 1], [], []>} : vector<64x4xf32>, vector<4x4xf32>, vector<64x4xf32> -> vector<64x4xf32>
    %111 = arith.addf %107, %110 : vector<64x4xf32>
    %c0_117 = arith.constant 0 : index
    %c0_118 = arith.constant 0 : index
    %112 = vector.load %arg8[%c0_117, %c0_118] : memref<64x4xf32, #tpu.memory_space<vmem>>, vector<64x4xf32>
    tpu.vector_store %arg8[%c0_117, %c0_118], %111 {strides = array<i32>} : memref<64x4xf32, #tpu.memory_space<vmem>>, vector<64x4xf32>,
    %113 = vector.extract_strided_slice %14 {offsets = [2, 0, 0], sizes = [4, 16, 4], strides = [1, 1, 1]} : vector<6x16x4xf32> to vector<4x16x4xf32>
    %114 = vector.shape_cast %113 : vector<4x16x4xf32> to vector<64x4xf32>
    %c0_119 = arith.constant 0 : index
    %c0_120 = arith.constant 0 : index
    %115 = vector.load %arg8[%c0_119, %c0_120] : memref<64x4xf32, #tpu.memory_space<vmem>>, vector<64x4xf32>
    %c2_121 = arith.constant 2 : index
    %c2_122 = arith.constant 2 : index
    %c0_123 = arith.constant 0 : index
    %c0_124 = arith.constant 0 : index
    %116 = vector.load %arg5[%c2_121, %c2_122, %c0_123, %c0_124] : memref<4x4x4x4xf32, #tpu.memory_space<vmem>>, vector<1x1x4x4xf32>
    %117 = vector.shape_cast %116 : vector<1x1x4x4xf32> to vector<4x4xf32>
    %cst_125 = arith.constant dense<0.000000e+00> : vector<64x4xf32>
    %118 = tpu.matmul %114, %117, %cst_125 {dimension_numbers = #tpu.dot_dimension_numbers<[1], [0], [0], [1], [0, 0, 1, 1], [], []>} : vector<64x4xf32>, vector<4x4xf32>, vector<64x4xf32> -> vector<64x4xf32>
    %119 = arith.addf %115, %118 : vector<64x4xf32>
    %c0_126 = arith.constant 0 : index
    %c0_127 = arith.constant 0 : index
    %120 = vector.load %arg8[%c0_126, %c0_127] : memref<64x4xf32, #tpu.memory_space<vmem>>, vector<64x4xf32>
    tpu.vector_store %arg8[%c0_126, %c0_127], %119 {strides = array<i32>} : memref<64x4xf32, #tpu.memory_space<vmem>>, vector<64x4xf32>,
    %121 = vector.extract_strided_slice %11 {offsets = [2, 0, 0], sizes = [4, 16, 4], strides = [1, 1, 1]} : vector<6x16x4xf32> to vector<4x16x4xf32>
    %122 = vector.shape_cast %121 : vector<4x16x4xf32> to vector<64x4xf32>
    %c0_128 = arith.constant 0 : index
    %c0_129 = arith.constant 0 : index
    %123 = vector.load %arg8[%c0_128, %c0_129] : memref<64x4xf32, #tpu.memory_space<vmem>>, vector<64x4xf32>
    %c2_130 = arith.constant 2 : index
    %c3_131 = arith.constant 3 : index
    %c0_132 = arith.constant 0 : index
    %c0_133 = arith.constant 0 : index
    %124 = vector.load %arg5[%c2_130, %c3_131, %c0_132, %c0_133] : memref<4x4x4x4xf32, #tpu.memory_space<vmem>>, vector<1x1x4x4xf32>
    %125 = vector.shape_cast %124 : vector<1x1x4x4xf32> to vector<4x4xf32>
    %cst_134 = arith.constant dense<0.000000e+00> : vector<64x4xf32>
    %126 = tpu.matmul %122, %125, %cst_134 {dimension_numbers = #tpu.dot_dimension_numbers<[1], [0], [0], [1], [0, 0, 1, 1], [], []>} : vector<64x4xf32>, vector<4x4xf32>, vector<64x4xf32> -> vector<64x4xf32>
    %127 = arith.addf %123, %126 : vector<64x4xf32>
    %c0_135 = arith.constant 0 : index
    %c0_136 = arith.constant 0 : index
    %128 = vector.load %arg8[%c0_135, %c0_136] : memref<64x4xf32, #tpu.memory_space<vmem>>, vector<64x4xf32>
    tpu.vector_store %arg8[%c0_135, %c0_136], %127 {strides = array<i32>} : memref<64x4xf32, #tpu.memory_space<vmem>>, vector<64x4xf32>,
    %c0_137 = arith.constant 0 : index
    %c0_138 = arith.constant 0 : index
    %129 = vector.load %arg8[%c0_137, %c0_138] : memref<64x4xf32, #tpu.memory_space<vmem>>, vector<64x4xf32>
    %130 = vector.shape_cast %129 : vector<64x4xf32> to vector<4x16x4xf32>
    %c2_139 = arith.constant 2 : index
    %c0_140 = arith.constant 0 : index
    %c0_141 = arith.constant 0 : index
    %c0_142 = arith.constant 0 : index
    %131 = vector.load %arg7[%c2_139, %c0_140, %c0_141, %c0_142] : memref<4x4x16x4xf32, #tpu.memory_space<vmem>>, vector<1x4x16x4xf32>
    %132 = vector.shape_cast %131 : vector<1x4x16x4xf32> to vector<4x16x4xf32>
    %133 = vector.shape_cast %130 : vector<4x16x4xf32> to vector<1x4x16x4xf32>
    tpu.vector_store %arg7[%c2_139, %c0_140, %c0_141, %c0_142], %133 {strides = array<i32>} : memref<4x4x16x4xf32, #tpu.memory_space<vmem>>, vector<1x4x16x4xf32>,
    %c0_143 = arith.constant 0 : index
    %c0_144 = arith.constant 0 : index
    %134 = vector.load %arg8[%c0_143, %c0_144] : memref<64x4xf32, #tpu.memory_space<vmem>>, vector<64x4xf32>
    tpu.vector_store %arg8[%c0_143, %c0_144], %19 {strides = array<i32>} : memref<64x4xf32, #tpu.memory_space<vmem>>, vector<64x4xf32>,
    %135 = vector.extract_strided_slice %11 {offsets = [1, 0, 0], sizes = [4, 16, 4], strides = [1, 1, 1]} : vector<6x16x4xf32> to vector<4x16x4xf32>
    %136 = vector.shape_cast %135 : vector<4x16x4xf32> to vector<64x4xf32>
    %c0_145 = arith.constant 0 : index
    %c0_146 = arith.constant 0 : index
    %137 = vector.load %arg8[%c0_145, %c0_146] : memref<64x4xf32, #tpu.memory_space<vmem>>, vector<64x4xf32>
    %c3_147 = arith.constant 3 : index
    %c0_148 = arith.constant 0 : index
    %c0_149 = arith.constant 0 : index
    %c0_150 = arith.constant 0 : index
    %138 = vector.load %arg5[%c3_147, %c0_148, %c0_149, %c0_150] : memref<4x4x4x4xf32, #tpu.memory_space<vmem>>, vector<1x1x4x4xf32>
    %139 = vector.shape_cast %138 : vector<1x1x4x4xf32> to vector<4x4xf32>
    %cst_151 = arith.constant dense<0.000000e+00> : vector<64x4xf32>
    %140 = tpu.matmul %136, %139, %cst_151 {dimension_numbers = #tpu.dot_dimension_numbers<[1], [0], [0], [1], [0, 0, 1, 1], [], []>} : vector<64x4xf32>, vector<4x4xf32>, vector<64x4xf32> -> vector<64x4xf32>
    %141 = arith.addf %137, %140 : vector<64x4xf32>
    %c0_152 = arith.constant 0 : index
    %c0_153 = arith.constant 0 : index
    %142 = vector.load %arg8[%c0_152, %c0_153] : memref<64x4xf32, #tpu.memory_space<vmem>>, vector<64x4xf32>
    tpu.vector_store %arg8[%c0_152, %c0_153], %141 {strides = array<i32>} : memref<64x4xf32, #tpu.memory_space<vmem>>, vector<64x4xf32>,
    %143 = vector.extract_strided_slice %16 {offsets = [1, 0, 0], sizes = [4, 16, 4], strides = [1, 1, 1]} : vector<6x16x4xf32> to vector<4x16x4xf32>
    %144 = vector.shape_cast %143 : vector<4x16x4xf32> to vector<64x4xf32>
    %c0_154 = arith.constant 0 : index
    %c0_155 = arith.constant 0 : index
    %145 = vector.load %arg8[%c0_154, %c0_155] : memref<64x4xf32, #tpu.memory_space<vmem>>, vector<64x4xf32>
    %c3_156 = arith.constant 3 : index
    %c1_157 = arith.constant 1 : index
    %c0_158 = arith.constant 0 : index
    %c0_159 = arith.constant 0 : index
    %146 = vector.load %arg5[%c3_156, %c1_157, %c0_158, %c0_159] : memref<4x4x4x4xf32, #tpu.memory_space<vmem>>, vector<1x1x4x4xf32>
    %147 = vector.shape_cast %146 : vector<1x1x4x4xf32> to vector<4x4xf32>
    %cst_160 = arith.constant dense<0.000000e+00> : vector<64x4xf32>
    %148 = tpu.matmul %144, %147, %cst_160 {dimension_numbers = #tpu.dot_dimension_numbers<[1], [0], [0], [1], [0, 0, 1, 1], [], []>} : vector<64x4xf32>, vector<4x4xf32>, vector<64x4xf32> -> vector<64x4xf32>
    %149 = arith.addf %145, %148 : vector<64x4xf32>
    %c0_161 = arith.constant 0 : index
    %c0_162 = arith.constant 0 : index
    %150 = vector.load %arg8[%c0_161, %c0_162] : memref<64x4xf32, #tpu.memory_space<vmem>>, vector<64x4xf32>
    tpu.vector_store %arg8[%c0_161, %c0_162], %149 {strides = array<i32>} : memref<64x4xf32, #tpu.memory_space<vmem>>, vector<64x4xf32>,
    %151 = vector.extract_strided_slice %11 {offsets = [2, 0, 0], sizes = [4, 16, 4], strides = [1, 1, 1]} : vector<6x16x4xf32> to vector<4x16x4xf32>
    %152 = vector.shape_cast %151 : vector<4x16x4xf32> to vector<64x4xf32>
    %c0_163 = arith.constant 0 : index
    %c0_164 = arith.constant 0 : index
    %153 = vector.load %arg8[%c0_163, %c0_164] : memref<64x4xf32, #tpu.memory_space<vmem>>, vector<64x4xf32>
    %c3_165 = arith.constant 3 : index
    %c2_166 = arith.constant 2 : index
    %c0_167 = arith.constant 0 : index
    %c0_168 = arith.constant 0 : index
    %154 = vector.load %arg5[%c3_165, %c2_166, %c0_167, %c0_168] : memref<4x4x4x4xf32, #tpu.memory_space<vmem>>, vector<1x1x4x4xf32>
    %155 = vector.shape_cast %154 : vector<1x1x4x4xf32> to vector<4x4xf32>
    %cst_169 = arith.constant dense<0.000000e+00> : vector<64x4xf32>
    %156 = tpu.matmul %152, %155, %cst_169 {dimension_numbers = #tpu.dot_dimension_numbers<[1], [0], [0], [1], [0, 0, 1, 1], [], []>} : vector<64x4xf32>, vector<4x4xf32>, vector<64x4xf32> -> vector<64x4xf32>
    %157 = arith.addf %153, %156 : vector<64x4xf32>
    %c0_170 = arith.constant 0 : index
    %c0_171 = arith.constant 0 : index
    %158 = vector.load %arg8[%c0_170, %c0_171] : memref<64x4xf32, #tpu.memory_space<vmem>>, vector<64x4xf32>
    tpu.vector_store %arg8[%c0_170, %c0_171], %157 {strides = array<i32>} : memref<64x4xf32, #tpu.memory_space<vmem>>, vector<64x4xf32>,
    %159 = vector.extract_strided_slice %16 {offsets = [2, 0, 0], sizes = [4, 16, 4], strides = [1, 1, 1]} : vector<6x16x4xf32> to vector<4x16x4xf32>
    %160 = vector.shape_cast %159 : vector<4x16x4xf32> to vector<64x4xf32>
    %c0_172 = arith.constant 0 : index
    %c0_173 = arith.constant 0 : index
    %161 = vector.load %arg8[%c0_172, %c0_173] : memref<64x4xf32, #tpu.memory_space<vmem>>, vector<64x4xf32>
    %c3_174 = arith.constant 3 : index
    %c3_175 = arith.constant 3 : index
    %c0_176 = arith.constant 0 : index
    %c0_177 = arith.constant 0 : index
    %162 = vector.load %arg5[%c3_174, %c3_175, %c0_176, %c0_177] : memref<4x4x4x4xf32, #tpu.memory_space<vmem>>, vector<1x1x4x4xf32>
    %163 = vector.shape_cast %162 : vector<1x1x4x4xf32> to vector<4x4xf32>
    %cst_178 = arith.constant dense<0.000000e+00> : vector<64x4xf32>
    %164 = tpu.matmul %160, %163, %cst_178 {dimension_numbers = #tpu.dot_dimension_numbers<[1], [0], [0], [1], [0, 0, 1, 1], [], []>} : vector<64x4xf32>, vector<4x4xf32>, vector<64x4xf32> -> vector<64x4xf32>
    %165 = arith.addf %161, %164 : vector<64x4xf32>
    %c0_179 = arith.constant 0 : index
    %c0_180 = arith.constant 0 : index
    %166 = vector.load %arg8[%c0_179, %c0_180] : memref<64x4xf32, #tpu.memory_space<vmem>>, vector<64x4xf32>
    tpu.vector_store %arg8[%c0_179, %c0_180], %165 {strides = array<i32>} : memref<64x4xf32, #tpu.memory_space<vmem>>, vector<64x4xf32>,
    %c0_181 = arith.constant 0 : index
    %c0_182 = arith.constant 0 : index
    %167 = vector.load %arg8[%c0_181, %c0_182] : memref<64x4xf32, #tpu.memory_space<vmem>>, vector<64x4xf32>
    %168 = vector.shape_cast %167 : vector<64x4xf32> to vector<4x16x4xf32>
    %c3_183 = arith.constant 3 : index
    %c0_184 = arith.constant 0 : index
    %c0_185 = arith.constant 0 : index
    %c0_186 = arith.constant 0 : index
    %169 = vector.load %arg7[%c3_183, %c0_184, %c0_185, %c0_186] : memref<4x4x16x4xf32, #tpu.memory_space<vmem>>, vector<1x4x16x4xf32>
    %170 = vector.shape_cast %169 : vector<1x4x16x4xf32> to vector<4x16x4xf32>
    %171 = vector.shape_cast %168 : vector<4x16x4xf32> to vector<1x4x16x4xf32>
    tpu.vector_store %arg7[%c3_183, %c0_184, %c0_185, %c0_186], %171 {strides = array<i32>} : memref<4x4x16x4xf32, #tpu.memory_space<vmem>>, vector<1x4x16x4xf32>,
    return
  }
  func.func @transform_0(%arg0: i32, %arg1: i32) -> (i32, i32, i32, i32) {
    %c0_i32 = arith.constant 0 : i32
    %c0_i32_0 = arith.constant 0 : i32
    %c0_i32_1 = arith.constant 0 : i32
    return %arg0, %arg1, %c0_i32, %c0_i32_0 : i32, i32, i32, i32
  }
  func.func @transform_1(%arg0: i32, %arg1: i32) -> (i32, i32, i32, i32) {
    %c4_i32 = arith.constant 4 : i32
    %0 = arith.muli %arg1, %c4_i32 : i32
    %c1_i32 = arith.constant 1 : i32
    %1 = arith.subi %0, %c1_i32 : i32
    %c0_i32 = arith.constant 0 : i32
    %2 = arith.maxsi %1, %c0_i32 : i32
    %c0_i32_0 = arith.constant 0 : i32
    %c0_i32_1 = arith.constant 0 : i32
    %c0_i32_2 = arith.constant 0 : i32
    return %arg0, %2, %c0_i32_0, %c0_i32_1 : i32, i32, i32, i32
  }
  func.func @transform_2(%arg0: i32, %arg1: i32) -> (i32, i32, i32, i32) {
    %c4_i32 = arith.constant 4 : i32
    %0 = arith.muli %arg1, %c4_i32 : i32
    %c4_i32_0 = arith.constant 4 : i32
    %1 = arith.addi %0, %c4_i32_0 : i32
    %c15_i32 = arith.constant 15 : i32
    %2 = arith.minsi %1, %c15_i32 : i32
    %c0_i32 = arith.constant 0 : i32
    %c0_i32_1 = arith.constant 0 : i32
    %c0_i32_2 = arith.constant 0 : i32
    return %arg0, %2, %c0_i32, %c0_i32_1 : i32, i32, i32, i32
  }
  func.func @transform_3(%arg0: i32, %arg1: i32) -> (i32, i32, i32, i32) {
    %c0_i32 = arith.constant 0 : i32
    %c0_i32_0 = arith.constant 0 : i32
    %c0_i32_1 = arith.constant 0 : i32
    %c0_i32_2 = arith.constant 0 : i32
    %c0_i32_3 = arith.constant 0 : i32
    return %c0_i32, %c0_i32_0, %c0_i32_1, %c0_i32_2 : i32, i32, i32, i32
  }
  func.func @transform_4(%arg0: i32, %arg1: i32) -> (i32, i32) {
    %c0_i32 = arith.constant 0 : i32
    %c0_i32_0 = arith.constant 0 : i32
    %c0_i32_1 = arith.constant 0 : i32
    return %c0_i32, %c0_i32_0 : i32, i32
  }
  func.func @transform_5(%arg0: i32, %arg1: i32) -> (i32, i32, i32, i32) {
    %c0_i32 = arith.constant 0 : i32
    %c0_i32_0 = arith.constant 0 : i32
    %c0_i32_1 = arith.constant 0 : i32
    return %arg0, %arg1, %c0_i32, %c0_i32_0 : i32, i32, i32, i32
  }
}

</mosaic_0001>

<bundles_post_ra>
// kernel: tpu_custom_call.1
= control target key start
LH: loop header
LB: loop body
LE: loop exit
PB: predicated region body
PF: predicated region fallthrough
CT: control target
= control target key end

     0   :  { %s3848_s18 = smov 0   ;;  %s3850_s19 = smov 0   ;;  %s5031_s0 = inlined_call_operand.vmem [shape: f32[2,16,16,4], index: 0, kind: input, shape index: {}]   ;;  %s5032_s1 = inlined_call_operand.vmem [shape: f32[2,16,16,4], index: 1, kind: input, shape index: {}]   ;;  %s5033_s2 = inlined_call_operand.vmem [shape: f32[2,16,16,4], index: 2, kind: input, shape index: {}]   ;;  %s5034_s3 = inlined_call_operand.vmem [shape: f32[4,4,4,4], index: 3, kind: input, shape index: {}]   ;;  %s5035_s4 = inlined_call_operand.vmem [shape: f32[1,4], index: 4, kind: input, shape index: {}]   ;;  %s5036_s5 = inlined_call_operand.vmem [shape: f32[8,16,16,4], index: 5, kind: output, shape index: {}]  }
   0x1   :  { %s3852_s20 = smov 0   ;;  %s3854_s21 = smov 0  }
   0x2   :  { %s3856_s22 = smov 0   ;;  %s3858_s23 = smov 0  }
   0x3   :  { %s3860_s24 = smov 0  }
   0x4 LB: > { %s24_s25 = sadd.s32 1, %s3808_s22  ;;  %s27_s26 = sadd.s32 1, %s3812_s23  ;;  %s3816_s24 = sphi %s3860_s24, %s15_s24   ;;  %s3812_s23 = sphi %s3858_s23, %s5044_s23   ;;  %s3808_s22 = sphi %s3856_s22, %s5043_s22   ;;  %s3804_s21 = sphi %s3854_s21, %s5042_s21   ;;  %s3800_s20 = sphi %s3852_s20, %s5041_s20   ;;  %s3796_s19 = sphi %s3850_s19, %s5040_s19   ;;  %s3792_s18 = sphi %s3848_s18, %s5039_s18  }
   0x5   : > { %p25_p0 = scmp.ge.s32.totalorder %s24_s25, 4  ;;  %s3097_s27 = sadd.s32 4294967295, %s3816_s24  }
   0x6   : > { %p188_p1 = scmp.ne.s32.totalorder %s3796_s19, %s3792_s18  ;;  %p189_p2 = scmp.eq.s32.totalorder %s3097_s27, 7 }
   0x7   : > { %s5046_s25 = smov (%p25_p0, %s24_s25), 0  ;;  %s5048_s26 = smov (!%p25_p0, %s27_s26), %s3812_s23 }
   0x8   : > { %s174_s28 = ssub.s32 %s3808_s22, %s5046_s25  ;;  %p29_p3 = scmp.ge.s32.totalorder %s5048_s26, 2 }
   0x9   : > { %p3107_p4 = scmp.ge.s32.totalorder %s3816_s24, 1  ;;  %p3894_p5 = por %p189_p2, %p188_p1 }
   0xa   : > { %p273_p6 = scmp.lt.s32.totalorder %s3816_s24, 9  ;;  %s5050_s26 = smov (%p29_p3, %s5048_s26), 0 }
   0xb   : > { %s173_s30 = ssub.s32 %s3812_s23, %s5050_s26  ;;  %s178_s7 = sadd.s32 1, %s3796_s19 }
   0xc   : > { %p274_p7 = pnand %p3107_p4, %p273_p6  ;;  %s175_s6 = sor.u32 %s174_s28, %s173_s30 }
   0xd   : > { %p176_p8 = scmp.eq.s32.totalorder %s175_s6, 0  ;;  %v500_v0 = vld [vmem:[%s5034_s3] sm:$0xf] (!%p274_p7)  ;;  %vm521_vm0 = vcmask (!%p274_p7), 1043456   ;;  %s3911_s11 = sshll.u32 (!%p274_p7), %s3800_s20, 2  ;;  %vm414_vm1 = vcmask (!%p274_p7), 1040384  }
   0xe   : > { %277 = sbr.rel (%p274_p7) target bundleno = 456 (0x1c8), region = 40  ;;  %p332_p9 = scmp.lt.s32.totalorder (!%p274_p7), %s3804_s21, 1  ;;  %3470 = vmatprep.subr.msk.mxu0 (!%p274_p7), %vm521_vm0, %v500_v0  ;;  %v3920_v1 = vld [vmem:[%s5034_s3 + $0x8] sm:$0xf] (!%p274_p7)  ;;  %v3140_v2 = vld [vmem:[%s5034_s3 + $0x4] sm:$0xf] (!%p274_p7) }
   0xf   : > { %s3905_s8 = scalar_select %p176_p8, %s3796_s19, %s178_s7  }
  0x10   : > { %p334_p10 = scmp.lt.s32.totalorder (!%p274_p7), %s3911_s11, 15  ;;  %s3114_s12 = sadd.s32 (!%p274_p7), 4294967295, %s3911_s11  ;;  %3471 = vmatpush3.msk.msra.mxu0 (!%p274_p7), %vm521_vm0, %v500_v0  ;;  %v3160_v3 = vld [vmem:[%s5034_s3 + $0xc] sm:$0xf] (!%p274_p7)  ;;  %3484 = vmatprep.subr.msk.mxu1 (!%p274_p7), %vm521_vm0, %v3140_v2  ;;  %vm483_vm2 = vcmask (!%p274_p7), 31744   ;;  %vm445_vm3 = vcmask (!%p274_p7), 1046528  }
  0x11   : > { %3498 = vmatprep.subr.msk.mxu0 (!%p274_p7), %vm521_vm0, %v3920_v1  ;;  %3485 = vmatpush3.msk.msra.mxu1 (!%p274_p7), %vm521_vm0, %v3140_v2  ;;  %p344_p11 = scmp.gt.s32.totalorder (!%p274_p7), %s3114_s12, 0  ;;  %p386_p12 = scmp.eq.s32.totalorder (!%p274_p7), %s3800_s20, 0  ;;  %v3981_v11 = vld [vmem:[%s5034_s3 + $0x14] sm:$0xf] (!%p274_p7)  ;;  %v3993_v14 = vld [vmem:[%s5035_s4] ss:$0 sm:$0xff] (!%p274_p7) }
  0x12   : > { %3512 = vmatprep.subr.msk.mxu1 (!%p274_p7), %vm521_vm0, %v3160_v3  ;;  %p3115_p13 = scmp.lt.s32.totalorder (!%p274_p7), %s3114_s12, 15  ;;  %s360_s16 = sadd.s32 (!%p274_p7), 4, %s3911_s11  ;;  %485 = vst.msk [vmem:[#allocation2 + $0x8] sm:$0xff] (!%p274_p7), %vm483_vm2, %v3993_v14  ;;  %484 = vst.msk [vmem:[#allocation2] sm:$0xff] (!%p274_p7), %vm483_vm2, %v3993_v14  ;;  %v3170_v21 = vld [vmem:[%s5034_s3 + $0x10] sm:$0xf] (!%p274_p7) }
  0x13   : > { %p3950_p0 = scmp.lt.s32.totalorder (!%p274_p7), %s360_s16, 15  ;;  %p394_p1 = scmp.eq.s32.totalorder (!%p274_p7), %s3800_s20, 3  ;;  %486 = vst.msk [vmem:[#allocation2 + $0x10] sm:$0xff] (!%p274_p7), %vm483_vm2, %v3993_v14  ;;  %487 = vst.msk [vmem:[#allocation2 + $0x18] sm:$0xff] (!%p274_p7), %vm483_vm2, %v3993_v14  ;;  %v3200_v41 = vld [vmem:[%s5034_s3 + $0x1c] sm:$0xf] (!%p274_p7) }
  0x14   : > { %488 = vst.msk [vmem:[#allocation2 + $0x20] sm:$0xff] (!%p274_p7), %vm483_vm2, %v3993_v14  ;;  %489 = vst.msk [vmem:[#allocation2 + $0x28] sm:$0xff] (!%p274_p7), %vm483_vm2, %v3993_v14  ;;  %v3190_v43 = vld [vmem:[%s5034_s3 + $0x18] sm:$0xf] (!%p274_p7)  ;;  %v3228_v58 = vld [vmem:[%s5034_s3 + $0x24] sm:$0xf] (!%p274_p7) }
  0x15   : > { %s333_s15 = scalar_select %p332_p9, %s3804_s21, 1  ;;  %490 = vst.msk [vmem:[#allocation2 + $0x30] sm:$0xff] %vm483_vm2, %v3993_v14  ;;  %491 = vst.msk [vmem:[#allocation2 + $0x38] sm:$0xff] %vm483_vm2, %v3993_v14  ;;  %v3218_v60 = vld [vmem:[%s5034_s3 + $0x20] sm:$0xf] }
  0x16   : > { %s335_s30 = scalar_select %p334_p10, %s3911_s11, 15 }
  0x17   : > { %s3934_s6 = sshll.u32 %s333_s15, 5  ;;  %s5052_s12 = smov (!%p344_p11, %s3114_s12), 0 }
  0x18   : > { %s3110_s7 = sshll.u32 %s335_s30, 1  ;;  %s5054_s12 = smov (!%p3115_p13, %s5052_s12), 15 }
  0x19   : > { %s338_s9 = sadd.s32 %s3934_s6, %s3110_s7  ;;  %s3120_s17 = sshll.u32 %s5054_s12, 1 }
  0x1a   : > { %s3112_s10 = sshll.u32 %s338_s9, 3  ;;  %s352_s27 = sadd.s32 %s3120_s17, %s3934_s6 }
  0x1b   : > { %s3943_s15 = scalar_lea.vmem %s5031_s0, %s3112_s10  ;;  %s3122_s28 = sshll.u32 %s352_s27, 3 }
  0x1c   : > { %v3948_v4 = vld [vmem:[%s3943_s15] sm:$0xff]  ;;  %s354_s13 = scalar_lea.vmem %s5032_s1, %s3122_s28  ;;  %v3962_v6 = vld [vmem:[%s3943_s15 + $0x8] sm:$0xff]  ;;  %v3965_v7 = vld [vmem:[%s3943_s15 + $0x10] sm:$0xff]  ;;  %s5056_s16 = smov (!%p3950_p0, %s360_s16), 15 }
  0x1d   : > { %s3751_s10 = scalar_select %p386_p12, 0, 255  ;;  %v418_v5 = vrot.slane %v3948_v4, 7  ;;  %v419_v13 = vrot.slane %v3962_v6, 7  ;;  %v3996_v15 = vld [vmem:[%s3943_s15 + $0x18] sm:$0xff]  ;;  %v421_v18 = vrot.slane %v3965_v7, 7 }
  0x1e   : > { %s5058_s16 = smov (!%p3950_p0, %s5056_s16), 15  ;;  %v4023_v19 = vld [vmem:[%s3943_s15 + $0x20] sm:$0xff]  ;;  %v422_v23 = vrot.slane %v3996_v15, 7  ;;  %v4043_v24 = vld [vmem:[%s3943_s15 + $0x28] sm:$0xff]  ;;  %v4115_v42 = vld [vmem:[%s3943_s15 + $0x30] sm:$0xff]  ;;  %v449_v51 = vrot.slane %v3948_v4, 1 }
  0x1f   : > { %v3967_v8 = vld [vmem:[%s354_s13] sm:%s3751_s10]  ;;  %v3973_v9 = vld [vmem:[%s354_s13 + $0x8] sm:%s3751_s10]  ;;  %v4000_v17 = vsel %vm414_vm1, 0.0, %v418_v5  ;;  %s3127_s30 = sshll.u32 %s5058_s16, 1  ;;  %v4037_v22 = vsel %vm414_vm1, %v418_v5, %v419_v13  ;;  %v4046_v25 = vsel %vm414_vm1, 0.0, %v421_v18  ;;  %v424_v26 = vrot.slane %v4023_v19, 7 }
  0x20   : > { %v415_v10 = vrot.slane %v3967_v8, 7  ;;  %3486 = vmatprep.mubr.msk.f32.mxu1 %vm483_vm2, %v3967_v8  ;;  %v416_v12 = vrot.slane %v3973_v9, 7  ;;  %s369_s7 = sadd.s32 %s3127_s30, %s3934_s6  ;;  %v4064_v27 = vsel %vm414_vm1, %v421_v18, %v422_v23  ;;  %v425_v28 = vrot.slane %v4043_v24, 7  ;;  %v4132_v45 = vld [vmem:[%s3943_s15 + $0x38] sm:$0xff]  ;;  %v3238_v5 = vld [vmem:[%s5034_s3 + $0x28] sm:$0xf] }
  0x21   : > { %3487 = vmatmul.mubr.msk.f32.vlgmr.msra.gmra.mrb[0].mxu1 %vm483_vm2, %v3973_v9  ;;  %s3129_s9 = sshll.u32 %s369_s7, 3  ;;  %v4070_v30 = vsel %vm414_vm1, 0.0, %v424_v26  ;;  %v427_v44 = vrot.slane %v4115_v42, 7  ;;  %v446_v46 = vrot.slane %v3967_v8, 1  ;;  %v447_v47 = vrot.slane %v3973_v9, 1  ;;  %s328_s28 = sand.u32 1, %s3792_s18  }
  0x22   : > { %v439_v16 = vsel %vm414_vm1, 0.0, %v415_v10  ;;  %3489 = vmatprep.mubr.msk.f32.mxu1 %vm483_vm2, %v3948_v4  ;;  %3513 = vmatpush3.msk.msra.mxu1 %vm521_vm0, %v3160_v3  ;;  %v417_v20 = vsel %vm414_vm1, %v415_v10, %v416_v12  ;;  %s371_s13 = scalar_lea.vmem %s5033_s2, %s3129_s9  ;;  %v4090_v37 = vsel %vm414_vm1, %v424_v26, %v425_v28  ;;  %v428_v48 = vrot.slane %v4132_v45, 7  ;;  %v3248_v3 = vld [vmem:[%s5034_s3 + $0x2c] sm:$0xf]  ;;  %v3276_v12 = vld [vmem:[%s5034_s3 + $0x34] sm:$0xf] }
  0x23   : > { %3472 = vmatprep.mubr.msk.f32.mxu0 %vm483_vm2, %v439_v16  ;;  %3540 = vmatprep.subr.msk.mxu1 %vm521_vm0, %v3981_v11  ;;  %s3757_s10 = scalar_select %p394_p1, 0, 255  ;;  %v4147_v49 = vsel %vm414_vm1, 0.0, %v427_v44  ;;  %v448_v50 = vsel %vm445_vm3, %v446_v46, %v447_v47  ;;  %v450_v52 = vrot.slane %v3962_v6, 1  ;;  %v470_v54 = vsel %vm445_vm3, %v447_v47, 0.0 }
  0x24   : > { %3473 = vmatmul.mubr.msk.f32.vlgmr.msra.gmra.mrb[0].mxu0 %vm483_vm2, %v417_v20  ;;  %v4161_v53 = vsel %vm414_vm1, %v427_v44, %v428_v48  ;;  %v452_v56 = vrot.slane %v3965_v7, 1  ;;  %v453_v57 = vrot.slane %v3996_v15, 1  ;;  %v455_v62 = vrot.slane %v4023_v19, 1  ;;  %v3266_v13 = vld [vmem:[%s5034_s3 + $0x30] sm:$0xf]  ;;  %s3108_s30 = sshll.u32 %s328_s28, 8 }
  0x25   : > { %3475 = vmatprep.mubr.msk.f32.mxu0 %vm483_vm2, %v4000_v17  ;;  %3499 = vmatpush3.msk.msra.mxu0 %vm521_vm0, %v3920_v1  ;;  %v4067_v29 = vld [vmem:[%s371_s13] sm:%s3757_s10]  ;;  %v4074_v31 = vld [vmem:[%s371_s13 + $0x8] sm:%s3757_s10]  ;;  %v4170_v55 = vsel %vm445_vm3, %v449_v51, %v450_v52  ;;  %v4183_v59 = vsel %vm445_vm3, %v450_v52, 0.0  ;;  %v456_v63 = vrot.slane %v4043_v24, 1  ;;  %s4472_s18 = scalar_lea.vmem [#allocation3], %s3108_s30  ;;  %s3324_s7 = sshll.u32 (%p3894_p5), %s3800_s20, 3 }
  0x26   : > { %3490 = vmatmul.mubr.msk.f32.gmra.mrb[2].mxu1 %vm483_vm2, %v3962_v6  ;;  %3526 = vmatprep.subr.msk.mxu0 %vm521_vm0, %v3170_v21  ;;  %v430_v32 = vrot.slane %v4067_v29, 7  ;;  %v461_v33 = vrot.slane %v4067_v29, 1  ;;  %v431_v34 = vrot.slane %v4074_v31, 7  ;;  %v462_v35 = vrot.slane %v4074_v31, 1  ;;  %v3296_v16 = vld [vmem:[%s5034_s3 + $0x3c] sm:$0xf] }
  0x27   : > { %3492 = vmatprep.mubr.msk.f32.mxu1 %vm483_vm2, %v3965_v7  ;;  %v4192_v61 = vsel %vm445_vm3, %v452_v56, %v453_v57  ;;  %v4206_v0 = vsel %vm445_vm3, %v453_v57, 0.0  ;;  %v4211_v1 = vsel %vm445_vm3, %v455_v62, %v456_v63  ;;  %v4220_v2 = vsel %vm445_vm3, %v456_v63, 0.0  ;;  %s3325_s9 = sshll.u32 (%p3894_p5), %s3804_s21, 7 }
  0x28   : > { %3476 = vmatmul.mubr.msk.f32.gmra.mrb[2].mxu0 %vm483_vm2, %v4037_v22  ;;  %v4085_v36 = vsel %vm414_vm1, 0.0, %v430_v32  ;;  %v4093_v38 = vsel %vm414_vm1, %v430_v32, %v431_v34  ;;  %v4096_v39 = vsel %vm445_vm3, %v461_v33, %v462_v35  ;;  %v4099_v40 = vsel %vm445_vm3, %v462_v35, 0.0  ;;  %v496_v32 = vld [vmem:[#allocation2 + $0x20] sm:$0xff]  ;;  %s2822_s29 = sadd.s32 (%p3894_p5), %s3325_s9, %s3324_s7 }
  0x29   : > { %3478 = vmatprep.mubr.msk.f32.mxu0 %vm483_vm2, %v4046_v25  ;;  %s3319_s6 = sshll.u32 (%p3894_p5), %s2822_s29, 3 }
  0x2a   : > { %3493 = vmatmul.mubr.msk.f32.gmra.mrb[4].mxu1 %vm483_vm2, %v3996_v15  ;;  %s4953_s10 = scalar_lea.vmem (%p3894_p5), %s5036_s5, %s3319_s6 }
  0x2b   : > { %3495 = vmatprep.mubr.msk.f32.mxu1 %vm483_vm2, %v4023_v19 }
  0x2c   : > { %3479 = vmatmul.mubr.msk.f32.gmra.mrb[4].mxu0 %vm483_vm2, %v4064_v27 }
  0x2d   : > { %3481 = vmatprep.mubr.msk.f32.mxu0 %vm483_vm2, %v4070_v30 }
  0x2e   : > { %3496 = vmatmul.mubr.msk.f32.gmra.mrb[6].mxu1 %vm483_vm2, %v4043_v24 }
  0x2f   : > { %3514 = vmatprep.mubr.msk.f32.mxu1 %vm483_vm2, %v3948_v4 }
  0x30   : > { %3482 = vmatmul.mubr.msk.f32.gmra.mrb[6].mxu0 %vm483_vm2, %v4090_v37 }
  0x31   : > { %3500 = vmatprep.mubr.msk.f32.mxu0 %vm483_vm2, %v4000_v17 }
  0x32   : > { %3515 = vmatmul.mubr.msk.f32.vlgmr.msra.gmra.mrb[8].mxu1 %vm483_vm2, %v3962_v6 }
  0x33   : > { %3517 = vmatprep.mubr.msk.f32.mxu1 %vm483_vm2, %v3965_v7  ;;  %3541 = vmatpush3.msk.msra.mxu1 %vm521_vm0, %v3981_v11 }
  0x34   : > { %3501 = vmatmul.mubr.msk.f32.vlgmr.msra.gmra.mrb[8].mxu0 %vm483_vm2, %v4037_v22  ;;  %3568 = vmatprep.subr.msk.mxu1 %vm521_vm0, %v3200_v41 }
  0x35   : > { %3503 = vmatprep.mubr.msk.f32.mxu0 %vm483_vm2, %v4046_v25  ;;  %3527 = vmatpush3.msk.msra.mxu0 %vm521_vm0, %v3170_v21 }
  0x36   : > { %3518 = vmatmul.mubr.msk.f32.gmra.mrb[10].mxu1 %vm483_vm2, %v3996_v15  ;;  %3554 = vmatprep.subr.msk.mxu0 %vm521_vm0, %v3190_v43 }
  0x37   : > { %3520 = vmatprep.mubr.msk.f32.mxu1 %vm483_vm2, %v4023_v19 }
  0x38   : > { %3504 = vmatmul.mubr.msk.f32.gmra.mrb[10].mxu0 %vm483_vm2, %v4064_v27 }
  0x39   : > { %3506 = vmatprep.mubr.msk.f32.mxu0 %vm483_vm2, %v4070_v30 }
  0x3a   : > { %3521 = vmatmul.mubr.msk.f32.gmra.mrb[12].mxu1 %vm483_vm2, %v4043_v24 }
  0x3b   : > { %3523 = vmatprep.mubr.msk.f32.mxu1 %vm483_vm2, %v4115_v42 }
  0x3c   : > { %3507 = vmatmul.mubr.msk.f32.gmra.mrb[12].mxu0 %vm483_vm2, %v4090_v37 }
  0x3d   : > { %3509 = vmatprep.mubr.msk.f32.mxu0 %vm483_vm2, %v4147_v49 }
  0x3e   : > { %3524 = vmatmul.mubr.msk.f32.gmra.mrb[14].mxu1 %vm483_vm2, %v4132_v45 }
  0x3f   : > { %3542 = vmatprep.mubr.msk.f32.mxu1 %vm483_vm2, %v448_v50 }
  0x40   : > { %3510 = vmatmul.mubr.msk.f32.gmra.mrb[14].mxu0 %vm483_vm2, %v4161_v53 }
  0x41   : > { %3528 = vmatprep.mubr.msk.f32.mxu0 %vm483_vm2, %v3967_v8  ;;  %v458_v8 = vrot.slane %v4115_v42, 1 }
  0x42   : > { %3543 = vmatmul.mubr.msk.f32.vlgmr.msra.gmra.mrb[16].mxu1 %vm483_vm2, %v470_v54 }
  0x43   : > { %3545 = vmatprep.mubr.msk.f32.mxu1 %vm483_vm2, %v4170_v55  ;;  %3569 = vmatpush3.msk.msra.mxu1 %vm521_vm0, %v3200_v41 }
  0x44   : > { %3529 = vmatmul.mubr.msk.f32.vlgmr.msra.gmra.mrb[16].mxu0 %vm483_vm2, %v3973_v9  ;;  %3596 = vmatprep.subr.msk.mxu1 %vm521_vm0, %v3228_v58  ;;  %v459_v9 = vrot.slane %v4132_v45, 1 }
  0x45   : > { %3531 = vmatprep.mubr.msk.f32.mxu0 %vm483_vm2, %v3948_v4  ;;  %3555 = vmatpush3.msk.msra.mxu0 %vm521_vm0, %v3190_v43  ;;  %v498_v43 = vld [vmem:[#allocation2 + $0x30] sm:$0xff] }
  0x46   : > { %3546 = vmatmul.mubr.msk.f32.gmra.mrb[18].mxu1 %vm483_vm2, %v4183_v59  ;;  %3582 = vmatprep.subr.msk.mxu0 %vm521_vm0, %v3218_v60  ;;  %v4261_v10 = vsel %vm445_vm3, %v458_v8, %v459_v9  ;;  %v4270_v11 = vsel %vm445_vm3, %v459_v9, 0.0 }
  0x47   : > { %3548 = vmatprep.mubr.msk.f32.mxu1 %vm483_vm2, %v4192_v61 }
  0x48   : > { %3532 = vmatmul.mubr.msk.f32.gmra.mrb[18].mxu0 %vm483_vm2, %v3962_v6 }
  0x49   : > { %3534 = vmatprep.mubr.msk.f32.mxu0 %vm483_vm2, %v3965_v7 }
  0x4a   : > { %3549 = vmatmul.mubr.msk.f32.gmra.mrb[20].mxu1 %vm483_vm2, %v4206_v0 }
  0x4b   : > { %3551 = vmatprep.mubr.msk.f32.mxu1 %vm483_vm2, %v4211_v1 }
  0x4c   : > { %3535 = vmatmul.mubr.msk.f32.gmra.mrb[20].mxu0 %vm483_vm2, %v3996_v15 }
  0x4d   : > { %3537 = vmatprep.mubr.msk.f32.mxu0 %vm483_vm2, %v4023_v19 }
  0x4e   : > { %3552 = vmatmul.mubr.msk.f32.gmra.mrb[22].mxu1 %vm483_vm2, %v4220_v2 }
  0x4f   : > { %3570 = vmatprep.mubr.msk.f32.mxu1 %vm483_vm2, %v4170_v55 }
  0x50   : > { %3538 = vmatmul.mubr.msk.f32.gmra.mrb[22].mxu0 %vm483_vm2, %v4043_v24 }
  0x51   : > { %3556 = vmatprep.mubr.msk.f32.mxu0 %vm483_vm2, %v3948_v4 }
  0x52   : > { %3571 = vmatmul.mubr.msk.f32.vlgmr.msra.gmra.mrb[24].mxu1 %vm483_vm2, %v4183_v59 }
  0x53   : > { %3573 = vmatprep.mubr.msk.f32.mxu1 %vm483_vm2, %v4192_v61  ;;  %3597 = vmatpush3.msk.msra.mxu1 %vm521_vm0, %v3228_v58 }
  0x54   : > { %3557 = vmatmul.mubr.msk.f32.vlgmr.msra.gmra.mrb[24].mxu0 %vm483_vm2, %v3962_v6  ;;  %3624 = vmatprep.subr.msk.mxu1 %vm521_vm0, %v3248_v3 }
  0x55   : > { %3559 = vmatprep.mubr.msk.f32.mxu0 %vm483_vm2, %v3965_v7  ;;  %3583 = vmatpush3.msk.msra.mxu0 %vm521_vm0, %v3218_v60 }
  0x56   : > { %3574 = vmatmul.mubr.msk.f32.gmra.mrb[26].mxu1 %vm483_vm2, %v4206_v0  ;;  %3610 = vmatprep.subr.msk.mxu0 %vm521_vm0, %v3238_v5 }
  0x57   : > { %3576 = vmatprep.mubr.msk.f32.mxu1 %vm483_vm2, %v4211_v1 }
  0x58   : > { %3560 = vmatmul.mubr.msk.f32.gmra.mrb[26].mxu0 %vm483_vm2, %v3996_v15 }
  0x59   : > { %3562 = vmatprep.mubr.msk.f32.mxu0 %vm483_vm2, %v4023_v19 }
  0x5a   : > { %3577 = vmatmul.mubr.msk.f32.gmra.mrb[28].mxu1 %vm483_vm2, %v4220_v2 }
  0x5b   : > { %3579 = vmatprep.mubr.msk.f32.mxu1 %vm483_vm2, %v4261_v10 }
  0x5c   : > { %3563 = vmatmul.mubr.msk.f32.gmra.mrb[28].mxu0 %vm483_vm2, %v4043_v24 }
  0x5d   : > { %3565 = vmatprep.mubr.msk.f32.mxu0 %vm483_vm2, %v4115_v42 }
  0x5e   : > { %3580 = vmatmul.mubr.msk.f32.gmra.mrb[30].mxu1 %vm483_vm2, %v4270_v11 }
  0x5f   : > { %3598 = vmatprep.mubr.msk.f32.mxu1 %vm483_vm2, %v3948_v4 }
  0x60   : > { %3566 = vmatmul.mubr.msk.f32.gmra.mrb[30].mxu0 %vm483_vm2, %v4132_v45 }
  0x61   : > { %3584 = vmatprep.mubr.msk.f32.mxu0 %vm483_vm2, %v4000_v17  ;;  %v3286_v17 = vld [vmem:[%s5034_s3 + $0x38] sm:$0xf] }
  0x62   : > { %3599 = vmatmul.mubr.msk.f32.vlgmr.msra.gmra.mrb[32].mxu1 %vm483_vm2, %v3962_v6 }
  0x63   : > { %3601 = vmatprep.mubr.msk.f32.mxu1 %vm483_vm2, %v3965_v7  ;;  %3625 = vmatpush3.msk.msra.mxu1 %vm521_vm0, %v3248_v3 }
  0x64   : > { %3585 = vmatmul.mubr.msk.f32.vlgmr.msra.gmra.mrb[32].mxu0 %vm483_vm2, %v4037_v22  ;;  %3652 = vmatprep.subr.msk.mxu1 %vm521_vm0, %v3276_v12  ;;  %v495_v22 = vld [vmem:[#allocation2 + $0x18] sm:$0xff] }
  0x65   : > { %3587 = vmatprep.mubr.msk.f32.mxu0 %vm483_vm2, %v4046_v25  ;;  %3611 = vmatpush3.msk.msra.mxu0 %vm521_vm0, %v3238_v5 }
  0x66   : > { %3602 = vmatmul.mubr.msk.f32.gmra.mrb[34].mxu1 %vm483_vm2, %v3996_v15  ;;  %3638 = vmatprep.subr.msk.mxu0 %vm521_vm0, %v3266_v13 }
  0x67   : > { %3604 = vmatprep.mubr.msk.f32.mxu1 %vm483_vm2, %v4023_v19 }
  0x68   : > { %3588 = vmatmul.mubr.msk.f32.gmra.mrb[34].mxu0 %vm483_vm2, %v4064_v27 }
  0x69   : > { %3590 = vmatprep.mubr.msk.f32.mxu0 %vm483_vm2, %v4070_v30 }
  0x6a   : > { %3605 = vmatmul.mubr.msk.f32.gmra.mrb[36].mxu1 %vm483_vm2, %v4043_v24 }
  0x6b   : > { %3607 = vmatprep.mubr.msk.f32.mxu1 %vm483_vm2, %v4115_v42 }
  0x6c   : > { %3591 = vmatmul.mubr.msk.f32.gmra.mrb[36].mxu0 %vm483_vm2, %v4090_v37 }
  0x6d   : > { %3593 = vmatprep.mubr.msk.f32.mxu0 %vm483_vm2, %v4147_v49 }
  0x6e   : > { %3608 = vmatmul.mubr.msk.f32.gmra.mrb[38].mxu1 %vm483_vm2, %v4132_v45 }
  0x6f   : > { %3626 = vmatprep.mubr.msk.f32.mxu1 %vm483_vm2, %v3965_v7 }
  0x70   : > { %3594 = vmatmul.mubr.msk.f32.gmra.mrb[38].mxu0 %vm483_vm2, %v4161_v53 }
  0x71   : > { %3612 = vmatprep.mubr.msk.f32.mxu0 %vm483_vm2, %v4046_v25 }
  0x72   : > { %3627 = vmatmul.mubr.msk.f32.vlgmr.msra.gmra.mrb[40].mxu1 %vm483_vm2, %v3996_v15 }
  0x73   : > { %3629 = vmatprep.mubr.msk.f32.mxu1 %vm483_vm2, %v4023_v19  ;;  %3653 = vmatpush3.msk.msra.mxu1 %vm521_vm0, %v3276_v12 }
  0x74   : > { %3613 = vmatmul.mubr.msk.f32.vlgmr.msra.gmra.mrb[40].mxu0 %vm483_vm2, %v4064_v27  ;;  %3680 = vmatprep.subr.msk.mxu1 %vm521_vm0, %v3296_v16 }
  0x75   : > { %3615 = vmatprep.mubr.msk.f32.mxu0 %vm483_vm2, %v4070_v30  ;;  %3639 = vmatpush3.msk.msra.mxu0 %vm521_vm0, %v3266_v13  ;;  %v497_v30 = vld [vmem:[#allocation2 + $0x28] sm:$0xff] }
  0x76   : > { %3630 = vmatmul.mubr.msk.f32.gmra.mrb[42].mxu1 %vm483_vm2, %v4043_v24  ;;  %3666 = vmatprep.subr.msk.mxu0 %vm521_vm0, %v3286_v17 }
  0x77   : > { %3632 = vmatprep.mubr.msk.f32.mxu1 %vm483_vm2, %v4115_v42 }
  0x78   : > { %3616 = vmatmul.mubr.msk.f32.gmra.mrb[42].mxu0 %vm483_vm2, %v4090_v37 }
  0x79   : > { %3618 = vmatprep.mubr.msk.f32.mxu0 %vm483_vm2, %v4147_v49 }
  0x7a   : > { %3633 = vmatmul.mubr.msk.f32.gmra.mrb[44].mxu1 %vm483_vm2, %v4132_v45 }
  0x7b   : > { %3635 = vmatprep.mubr.msk.f32.mxu1 %vm483_vm2, %v4067_v29 }
  0x7c   : > { %3619 = vmatmul.mubr.msk.f32.gmra.mrb[44].mxu0 %vm483_vm2, %v4161_v53 }
  0x7d   : > { %3621 = vmatprep.mubr.msk.f32.mxu0 %vm483_vm2, %v4085_v36 }
  0x7e   : > { %3636 = vmatmul.mubr.msk.f32.gmra.mrb[46].mxu1 %vm483_vm2, %v4074_v31 }
  0x7f   : > { %3654 = vmatprep.mubr.msk.f32.mxu1 %vm483_vm2, %v4170_v55 }
  0x80   : > { %3622 = vmatmul.mubr.msk.f32.gmra.mrb[46].mxu0 %vm483_vm2, %v4093_v38 }
  0x81   : > { %3640 = vmatprep.mubr.msk.f32.mxu0 %vm483_vm2, %v3948_v4 }
  0x82   : > { %3655 = vmatmul.mubr.msk.f32.vlgmr.msra.gmra.mrb[48].mxu1 %vm483_vm2, %v4183_v59 }
  0x83   : > { %3657 = vmatprep.mubr.msk.f32.mxu1 %vm483_vm2, %v4192_v61  ;;  %3681 = vmatpush3.msk.msra.mxu1 %vm521_vm0, %v3296_v16 }
  0x84   : > { %3641 = vmatmul.mubr.msk.f32.vlgmr.msra.gmra.mrb[48].mxu0 %vm483_vm2, %v3962_v6  ;;  %v493_v6 = vld [vmem:[#allocation2 + $0x8] sm:$0xff] }
  0x85   : > { %3643 = vmatprep.mubr.msk.f32.mxu0 %vm483_vm2, %v3965_v7  ;;  %3667 = vmatpush3.msk.msra.mxu0 %vm521_vm0, %v3286_v17 }
  0x86   : > { %3658 = vmatmul.mubr.msk.f32.gmra.mrb[50].mxu1 %vm483_vm2, %v4206_v0 }
  0x87   : > { %3660 = vmatprep.mubr.msk.f32.mxu1 %vm483_vm2, %v4211_v1 }
  0x88   : > { %3644 = vmatmul.mubr.msk.f32.gmra.mrb[50].mxu0 %vm483_vm2, %v3996_v15 }
  0x89   : > { %3646 = vmatprep.mubr.msk.f32.mxu0 %vm483_vm2, %v4023_v19 }
  0x8a   : > { %3661 = vmatmul.mubr.msk.f32.gmra.mrb[52].mxu1 %vm483_vm2, %v4220_v2 }
  0x8b   : > { %3663 = vmatprep.mubr.msk.f32.mxu1 %vm483_vm2, %v4261_v10 }
  0x8c   : > { %3647 = vmatmul.mubr.msk.f32.gmra.mrb[52].mxu0 %vm483_vm2, %v4043_v24 }
  0x8d   : > { %3649 = vmatprep.mubr.msk.f32.mxu0 %vm483_vm2, %v4115_v42 }
  0x8e   : > { %3664 = vmatmul.mubr.msk.f32.gmra.mrb[54].mxu1 %vm483_vm2, %v4270_v11 }
  0x8f   : > { %3682 = vmatprep.mubr.msk.f32.mxu1 %vm483_vm2, %v4192_v61 }
  0x90   : > { %3650 = vmatmul.mubr.msk.f32.gmra.mrb[54].mxu0 %vm483_vm2, %v4132_v45 }
  0x91   : > { %3668 = vmatprep.mubr.msk.f32.mxu0 %vm483_vm2, %v3965_v7 }
  0x92   : > { %3683 = vmatmul.mubr.msk.f32.vlgmr.msra.gmra.mrb[56].mxu1 %vm483_vm2, %v4206_v0 }
  0x93   : > { %3685 = vmatprep.mubr.msk.f32.mxu1 %vm483_vm2, %v4211_v1 }
  0x94   : > { %3669 = vmatmul.mubr.msk.f32.vlgmr.msra.gmra.mrb[56].mxu0 %vm483_vm2, %v3996_v15  ;;  %v492_v15 = vld [vmem:[#allocation2] sm:$0xff] }
  0x95   : > { %3671 = vmatprep.mubr.msk.f32.mxu0 %vm483_vm2, %v4023_v19 }
  0x96   : > { %3686 = vmatmul.mubr.msk.f32.gmra.mrb[58].mxu1 %vm483_vm2, %v4220_v2 }
  0x97   : > { %3688 = vmatprep.mubr.msk.f32.mxu1 %vm483_vm2, %v4261_v10 }
  0x98   : > { %3672 = vmatmul.mubr.msk.f32.gmra.mrb[58].mxu0 %vm483_vm2, %v4043_v24  ;;  %v494_v24 = vld [vmem:[#allocation2 + $0x10] sm:$0xff] }
  0x99   : > { %3674 = vmatprep.mubr.msk.f32.mxu0 %vm483_vm2, %v4115_v42 }
  0x9a   : > { %3689 = vmatmul.mubr.msk.f32.gmra.mrb[60].mxu1 %vm483_vm2, %v4270_v11 }
  0x9b   : > { %3691 = vmatprep.mubr.msk.f32.mxu1 %vm483_vm2, %v4096_v39  ;;  %v499_v39 = vld [vmem:[#allocation2 + $0x38] sm:$0xff] }
  0x9c   : > { %3675 = vmatmul.mubr.msk.f32.gmra.mrb[60].mxu0 %vm483_vm2, %v4132_v45 }
  0x9d   : > { %3677 = vmatprep.mubr.msk.f32.mxu0 %vm483_vm2, %v4067_v29 }
  0x9e   : > { %3692 = vmatmul.mubr.msk.f32.gmra.mrb[62].mxu1 %vm483_vm2, %v4099_v40 }
  0xa0   : > { %3678 = vmatmul.mubr.msk.f32.gmra.mrb[62].mxu0 %vm483_vm2, %v4074_v31 }
  0xf4   : > { %v3488_v4 = vpop.f32.mrb[0].mxu1 }
  0xf5   : > { %v741_v7 = vpop.f32.mrb[1].mxu1 }
  0xf7   : > { %v3474_v18 = vpop.f32.mrb[0].mxu0 }
  0xf8   : > { %v631_v19 = vadd.f32 %v3474_v18, %v493_v6  ;;  %v591_v20 = vpop.f32.mrb[1].mxu0 }
  0xf9   : > { %v630_v21 = vadd.f32 %v591_v20, %v492_v15  ;;  %v3491_v23 = vpop.f32.mrb[2].mxu1 }
  0xfa   : > { %639 = vst.msk [vmem:[#allocation2 + $0x8] sm:$0xff] %vm483_vm2, %v631_v19  ;;  %v751_v25 = vpop.f32.mrb[3].mxu1 }
  0xfb   : > { %638 = vst.msk [vmem:[#allocation2] sm:$0xff] %vm483_vm2, %v630_v21  ;;  %v3477_v26 = vpop.f32.mrb[2].mxu0 }
  0xfc   : > { %v633_v27 = vadd.f32 %v3477_v26, %v495_v22  ;;  %v601_v28 = vpop.f32.mrb[3].mxu0 }
  0xfd   : > { %v632_v29 = vadd.f32 %v601_v28, %v494_v24  ;;  %v3494_v31 = vpop.f32.mrb[4].mxu1 }
  0xfe   : > { %641 = vst.msk [vmem:[#allocation2 + $0x18] sm:$0xff] %vm483_vm2, %v633_v27  ;;  %v761_v33 = vpop.f32.mrb[5].mxu1 }
  0xff   : > { %640 = vst.msk [vmem:[#allocation2 + $0x10] sm:$0xff] %vm483_vm2, %v632_v29  ;;  %v3480_v34 = vpop.f32.mrb[4].mxu0 }
 0x100   : > { %v635_v35 = vadd.f32 %v3480_v34, %v497_v30  ;;  %v611_v36 = vpop.f32.mrb[5].mxu0 }
 0x101   : > { %v634_v37 = vadd.f32 %v611_v36, %v496_v32  ;;  %v647_v38 = vld [vmem:[#allocation2 + $0x8] sm:$0xff]  ;;  %v3497_v40 = vpop.f32.mrb[6].mxu1 }
 0x102   : > { %643 = vst.msk [vmem:[#allocation2 + $0x28] sm:$0xff] %vm483_vm2, %v635_v35  ;;  %v781_v41 = vadd.f32 %v3488_v4, %v647_v38  ;;  %v646_v42 = vld [vmem:[#allocation2] sm:$0xff]  ;;  %v771_v44 = vpop.f32.mrb[7].mxu1 }
 0x103   : > { %642 = vst.msk [vmem:[#allocation2 + $0x20] sm:$0xff] %vm483_vm2, %v634_v37  ;;  %v780_v45 = vadd.f32 %v741_v7, %v646_v42  ;;  %v3483_v46 = vpop.f32.mrb[6].mxu0 }
 0x104   : > { %789 = vst.msk [vmem:[#allocation2 + $0x8] sm:$0xff] %vm483_vm2, %v781_v41  ;;  %v637_v47 = vadd.f32 %v3483_v46, %v499_v39  ;;  %v621_v48 = vpop.f32.mrb[7].mxu0 }
 0x105   : > { %788 = vst.msk [vmem:[#allocation2] sm:$0xff] %vm483_vm2, %v780_v45  ;;  %v636_v49 = vadd.f32 %v621_v48, %v498_v43  ;;  %v649_v50 = vld [vmem:[#allocation2 + $0x18] sm:$0xff]  ;;  %v3516_v51 = vpop.f32.mrb[8].mxu1 }
 0x106   : > { %645 = vst.msk [vmem:[#allocation2 + $0x38] sm:$0xff] %vm483_vm2, %v637_v47  ;;  %v783_v52 = vadd.f32 %v3491_v23, %v649_v50  ;;  %v648_v53 = vld [vmem:[#allocation2 + $0x10] sm:$0xff]  ;;  %v1018_v54 = vpop.f32.mrb[9].mxu1 }
 0x107   : > { %644 = vst.msk [vmem:[#allocation2 + $0x30] sm:$0xff] %vm483_vm2, %v636_v49  ;;  %v782_v55 = vadd.f32 %v751_v25, %v648_v53  ;;  %v3502_v56 = vpop.f32.mrb[8].mxu0 }
 0x108   : > { %791 = vst.msk [vmem:[#allocation2 + $0x18] sm:$0xff] %vm483_vm2, %v783_v52  ;;  %v880_v57 = vpop.f32.mrb[9].mxu0 }
 0x109   : > { %790 = vst.msk [vmem:[#allocation2 + $0x10] sm:$0xff] %vm483_vm2, %v782_v55  ;;  %v651_v58 = vld [vmem:[#allocation2 + $0x28] sm:$0xff]  ;;  %v3519_v59 = vpop.f32.mrb[10].mxu1 }
 0x10a   : > { %v785_v60 = vadd.f32 %v3494_v31, %v651_v58  ;;  %v650_v61 = vld [vmem:[#allocation2 + $0x20] sm:$0xff]  ;;  %v1028_v62 = vpop.f32.mrb[11].mxu1 }
 0x10b   : > { %v784_v63 = vadd.f32 %v761_v33, %v650_v61  ;;  %v797_v0 = vld [vmem:[#allocation2 + $0x8] sm:$0xff]  ;;  %v3505_v1 = vpop.f32.mrb[10].mxu0 }
 0x10c   : > { %793 = vst.msk [vmem:[#allocation2 + $0x28] sm:$0xff] %vm483_vm2, %v785_v60  ;;  %v920_v2 = vadd.f32 %v3502_v56, %v797_v0  ;;  %v796_v3 = vld [vmem:[#allocation2] sm:$0xff]  ;;  %v890_v5 = vpop.f32.mrb[11].mxu0 }
 0x10d   : > { %792 = vst.msk [vmem:[#allocation2 + $0x20] sm:$0xff] %vm483_vm2, %v784_v63  ;;  %v919_v8 = vadd.f32 %v880_v57, %v796_v3  ;;  %v653_v9 = vld [vmem:[#allocation2 + $0x38] sm:$0xff]  ;;  %v3522_v10 = vpop.f32.mrb[12].mxu1 }
 0x10e   : > { %928 = vst.msk [vmem:[#allocation2 + $0x8] sm:$0xff] %vm483_vm2, %v920_v2  ;;  %v787_v11 = vadd.f32 %v3497_v40, %v653_v9  ;;  %v652_v12 = vld [vmem:[#allocation2 + $0x30] sm:$0xff]  ;;  %v1038_v13 = vpop.f32.mrb[13].mxu1 }
 0x10f   : > { %927 = vst.msk [vmem:[#allocation2] sm:$0xff] %vm483_vm2, %v919_v8  ;;  %v786_v16 = vadd.f32 %v771_v44, %v652_v12  ;;  %v799_v17 = vld [vmem:[#allocation2 + $0x18] sm:$0xff]  ;;  %v3508_v4 = vpop.f32.mrb[12].mxu0 }
 0x110   : > { %795 = vst.msk [vmem:[#allocation2 + $0x38] sm:$0xff] %vm483_vm2, %v787_v11  ;;  %v922_v6 = vadd.f32 %v3505_v1, %v799_v17  ;;  %v798_v7 = vld [vmem:[#allocation2 + $0x10] sm:$0xff]  ;;  %v900_v15 = vpop.f32.mrb[13].mxu0 }
 0x111   : > { %794 = vst.msk [vmem:[#allocation2 + $0x30] sm:$0xff] %vm483_vm2, %v786_v16  ;;  %v921_v18 = vadd.f32 %v890_v5, %v798_v7  ;;  %v3525_v19 = vpop.f32.mrb[14].mxu1 }
 0x112   : > { %930 = vst.msk [vmem:[#allocation2 + $0x18] sm:$0xff] %vm483_vm2, %v922_v6  ;;  %v1048_v20 = vpop.f32.mrb[15].mxu1 }
 0x113   : > { %929 = vst.msk [vmem:[#allocation2 + $0x10] sm:$0xff] %vm483_vm2, %v921_v18  ;;  %v801_v21 = vld [vmem:[#allocation2 + $0x28] sm:$0xff]  ;;  %v3511_v22 = vpop.f32.mrb[14].mxu0 }
 0x114   : > { %v924_v23 = vadd.f32 %v3508_v4, %v801_v21  ;;  %v800_v24 = vld [vmem:[#allocation2 + $0x20] sm:$0xff]  ;;  %v910_v25 = vpop.f32.mrb[15].mxu0 }
 0x115   : > { %v923_v26 = vadd.f32 %v900_v15, %v800_v24  ;;  %v936_v27 = vld [vmem:[#allocation2 + $0x8] sm:$0xff]  ;;  %v4450_v28 = vpop.f32.mrb[16].mxu1 }
 0x116   : > { %932 = vst.msk [vmem:[#allocation2 + $0x28] sm:$0xff] %vm483_vm2, %v924_v23  ;;  %v1058_v29 = vadd.f32 %v3516_v51, %v936_v27  ;;  %v935_v30 = vld [vmem:[#allocation2] sm:$0xff]  ;;  %v4453_v31 = vpop.f32.mrb[17].mxu1 }
 0x117   : > { %931 = vst.msk [vmem:[#allocation2 + $0x20] sm:$0xff] %vm483_vm2, %v923_v26  ;;  %v1057_v32 = vadd.f32 %v1018_v54, %v935_v30  ;;  %v803_v33 = vld [vmem:[#allocation2 + $0x38] sm:$0xff]  ;;  %v3530_v34 = vpop.f32.mrb[16].mxu0 }
 0x118   : > { %1066 = vst.msk [vmem:[#allocation2 + $0x8] sm:$0xff] %vm483_vm2, %v1058_v29  ;;  %v926_v35 = vadd.f32 %v3511_v22, %v803_v33  ;;  %v802_v36 = vld [vmem:[#allocation2 + $0x30] sm:$0xff]  ;;  %v1176_v37 = vpop.f32.mrb[17].mxu0 }
 0x119   : > { %1065 = vst.msk [vmem:[#allocation2] sm:$0xff] %vm483_vm2, %v1057_v32  ;;  %v925_v38 = vadd.f32 %v910_v25, %v802_v36  ;;  %v938_v39 = vld [vmem:[#allocation2 + $0x18] sm:$0xff]  ;;  %v4459_v40 = vpop.f32.mrb[18].mxu1 }
 0x11a   : > { %934 = vst.msk [vmem:[#allocation2 + $0x38] sm:$0xff] %vm483_vm2, %v926_v35  ;;  %v1060_v41 = vadd.f32 %v3519_v59, %v938_v39  ;;  %v937_v42 = vld [vmem:[#allocation2 + $0x10] sm:$0xff]  ;;  %v4462_v43 = vpop.f32.mrb[19].mxu1 }
 0x11b   : > { %933 = vst.msk [vmem:[#allocation2 + $0x30] sm:$0xff] %vm483_vm2, %v925_v38  ;;  %v1059_v44 = vadd.f32 %v1028_v62, %v937_v42  ;;  %v3533_v45 = vpop.f32.mrb[18].mxu0 }
 0x11c   : > { %1068 = vst.msk [vmem:[#allocation2 + $0x18] sm:$0xff] %vm483_vm2, %v1060_v41  ;;  %v1186_v46 = vpop.f32.mrb[19].mxu0 }
 0x11d   : > { %1067 = vst.msk [vmem:[#allocation2 + $0x10] sm:$0xff] %vm483_vm2, %v1059_v44  ;;  %v940_v47 = vld [vmem:[#allocation2 + $0x28] sm:$0xff]  ;;  %v4467_v48 = vpop.f32.mrb[20].mxu1 }
 0x11e   : > { %v1062_v49 = vadd.f32 %v3522_v10, %v940_v47  ;;  %v939_v50 = vld [vmem:[#allocation2 + $0x20] sm:$0xff]  ;;  %v4469_v51 = vpop.f32.mrb[21].mxu1 }
 0x11f   : > { %v1061_v52 = vadd.f32 %v1038_v13, %v939_v50  ;;  %v1074_v53 = vld [vmem:[#allocation2 + $0x8] sm:$0xff]  ;;  %v3536_v54 = vpop.f32.mrb[20].mxu0 }
 0x120   : > { %1070 = vst.msk [vmem:[#allocation2 + $0x28] sm:$0xff] %vm483_vm2, %v1062_v49  ;;  %1082 = vst.msk [vmem:[%s4472_s18 + $0x8] sm:$0xff] %vm483_vm2, %v1074_v53  ;;  %v1073_v55 = vld [vmem:[#allocation2] sm:$0xff]  ;;  %v1196_v56 = vpop.f32.mrb[21].mxu0 }
 0x121   : > { %1090 = vst.msk [vmem:[#allocation2 + $0x8] sm:$0xff] %vm483_vm2, %v3993_v14  ;;  %1069 = vst.msk [vmem:[#allocation2 + $0x20] sm:$0xff] %vm483_vm2, %v1061_v52  ;;  %v942_v57 = vld [vmem:[#allocation2 + $0x38] sm:$0xff]  ;;  %v4483_v58 = vpop.f32.mrb[22].mxu1 }
 0x122   : > { %1081 = vst.msk [vmem:[%s4472_s18] sm:$0xff] %vm483_vm2, %v1073_v55  ;;  %1089 = vst.msk [vmem:[#allocation2] sm:$0xff] %vm483_vm2, %v3993_v14  ;;  %v1064_v59 = vadd.f32 %v3525_v19, %v942_v57  ;;  %v941_v60 = vld [vmem:[#allocation2 + $0x30] sm:$0xff]  ;;  %v4485_v61 = vpop.f32.mrb[23].mxu1 }
 0x123   : > { %v1063_v62 = vadd.f32 %v1048_v20, %v941_v60  ;;  %v1076_v63 = vld [vmem:[#allocation2 + $0x18] sm:$0xff]  ;;  %v3539_v0 = vpop.f32.mrb[22].mxu0 }
 0x124   : > { %1072 = vst.msk [vmem:[#allocation2 + $0x38] sm:$0xff] %vm483_vm2, %v1064_v59  ;;  %1084 = vst.msk [vmem:[%s4472_s18 + $0x18] sm:$0xff] %vm483_vm2, %v1076_v63  ;;  %v1075_v1 = vld [vmem:[#allocation2 + $0x10] sm:$0xff]  ;;  %v1206_v2 = vpop.f32.mrb[23].mxu0 }
 0x125   : > { %1092 = vst.msk [vmem:[#allocation2 + $0x18] sm:$0xff] %vm483_vm2, %v3993_v14  ;;  %1071 = vst.msk [vmem:[#allocation2 + $0x30] sm:$0xff] %vm483_vm2, %v1063_v62  ;;  %v4497_v3 = vpop.f32.mrb[24].mxu1 }
 0x126   : > { %1083 = vst.msk [vmem:[%s4472_s18 + $0x10] sm:$0xff] %vm483_vm2, %v1075_v1  ;;  %1091 = vst.msk [vmem:[#allocation2 + $0x10] sm:$0xff] %vm483_vm2, %v3993_v14  ;;  %v4499_v5 = vpop.f32.mrb[25].mxu1 }
 0x127   : > { %v1078_v9 = vld [vmem:[#allocation2 + $0x28] sm:$0xff]  ;;  %v4501_v10 = vpop.f32.mrb[24].mxu0 }
 0x128   : > { %v1098_v8 = vld [vmem:[#allocation2 + $0x8] sm:$0xff]  ;;  %1086 = vst.msk [vmem:[%s4472_s18 + $0x28] sm:$0xff] %vm483_vm2, %v1078_v9  ;;  %1094 = vst.msk [vmem:[#allocation2 + $0x28] sm:$0xff] %vm483_vm2, %v3993_v14  ;;  %v1077_v13 = vld [vmem:[#allocation2 + $0x20] sm:$0xff]  ;;  %v4507_v16 = vpop.f32.mrb[25].mxu0 }
 0x129   : > { %v1216_v11 = vadd.f32 %v3530_v34, %v1098_v8  ;;  %v1097_v12 = vld [vmem:[#allocation2] sm:$0xff]  ;;  %1085 = vst.msk [vmem:[%s4472_s18 + $0x20] sm:$0xff] %vm483_vm2, %v1077_v13  ;;  %1093 = vst.msk [vmem:[#allocation2 + $0x20] sm:$0xff] %vm483_vm2, %v3993_v14  ;;  %v4513_v4 = vpop.f32.mrb[26].mxu1 }
 0x12a   : > { %v1215_v17 = vadd.f32 %v1176_v37, %v1097_v12  ;;  %v4516_v6 = vpop.f32.mrb[27].mxu1 }
 0x12b   : > { %1224 = vst.msk [vmem:[#allocation2 + $0x8] sm:$0xff] %vm483_vm2, %v1216_v11  ;;  %v1080_v15 = vld [vmem:[#allocation2 + $0x38] sm:$0xff]  ;;  %v4519_v18 = vpop.f32.mrb[26].mxu0 }
 0x12c   : > { %1223 = vst.msk [vmem:[#allocation2] sm:$0xff] %vm483_vm2, %v1215_v17  ;;  %v1100_v7 = vld [vmem:[#allocation2 + $0x18] sm:$0xff]  ;;  %1088 = vst.msk [vmem:[%s4472_s18 + $0x38] sm:$0xff] %vm483_vm2, %v1080_v15  ;;  %v1079_v21 = vld [vmem:[#allocation2 + $0x30] sm:$0xff]  ;;  %v4525_v22 = vpop.f32.mrb[27].mxu0 }
 0x12d   : > { %v1218_v19 = vadd.f32 %v3533_v45, %v1100_v7  ;;  %v1099_v20 = vld [vmem:[#allocation2 + $0x10] sm:$0xff]  ;;  %1096 = vst.msk [vmem:[#allocation2 + $0x38] sm:$0xff] %vm483_vm2, %v3993_v14  ;;  %1087 = vst.msk [vmem:[%s4472_s18 + $0x30] sm:$0xff] %vm483_vm2, %v1079_v21  ;;  %v4531_v24 = vpop.f32.mrb[28].mxu1 }
 0x12e   : > { %v1217_v23 = vadd.f32 %v1186_v46, %v1099_v20  ;;  %1095 = vst.msk [vmem:[#allocation2 + $0x30] sm:$0xff] %vm483_vm2, %v3993_v14  ;;  %v4534_v25 = vpop.f32.mrb[29].mxu1 }
 0x12f   : > { %1226 = vst.msk [vmem:[#allocation2 + $0x18] sm:$0xff] %vm483_vm2, %v1218_v19  ;;  %v1102_v26 = vld [vmem:[#allocation2 + $0x28] sm:$0xff]  ;;  %v4537_v27 = vpop.f32.mrb[28].mxu0 }
 0x130   : > { %1225 = vst.msk [vmem:[#allocation2 + $0x10] sm:$0xff] %vm483_vm2, %v1217_v23  ;;  %v1220_v29 = vadd.f32 %v3536_v54, %v1102_v26  ;;  %v1101_v30 = vld [vmem:[#allocation2 + $0x20] sm:$0xff]  ;;  %v4539_v32 = vpop.f32.mrb[29].mxu0 }
 0x131   : > { %v1219_v33 = vadd.f32 %v1196_v56, %v1101_v30  ;;  %v4541_v35 = vpop.f32.mrb[30].mxu1 }
 0x132   : > { %v1232_v34 = vld [vmem:[#allocation2 + $0x8] sm:$0xff]  ;;  %1228 = vst.msk [vmem:[#allocation2 + $0x28] sm:$0xff] %vm483_vm2, %v1220_v29  ;;  %v4545_v38 = vpop.f32.mrb[31].mxu1 }
 0x133   : > { %v1370_v36 = vadd.f32 %v4450_v28, %v1232_v34  ;;  %v1231_v37 = vld [vmem:[#allocation2] sm:$0xff]  ;;  %1227 = vst.msk [vmem:[#allocation2 + $0x20] sm:$0xff] %vm483_vm2, %v1219_v33  ;;  %v4549_v42 = vpop.f32.mrb[30].mxu0 }
 0x134   : > { %v1369_v39 = vadd.f32 %v4453_v31, %v1231_v37  ;;  %v1104_v41 = vld [vmem:[#allocation2 + $0x38] sm:$0xff]  ;;  %v4552_v46 = vpop.f32.mrb[31].mxu0 }
 0x135   : > { %1378 = vst.msk [vmem:[#allocation2 + $0x8] sm:$0xff] %vm483_vm2, %v1370_v36  ;;  %v1222_v44 = vadd.f32 %v3539_v0, %v1104_v41  ;;  %v1103_v45 = vld [vmem:[#allocation2 + $0x30] sm:$0xff]  ;;  %v4555_v49 = vpop.f32.mrb[32].mxu1 }
 0x136   : > { %1377 = vst.msk [vmem:[#allocation2] sm:$0xff] %vm483_vm2, %v1369_v39  ;;  %v1221_v47 = vadd.f32 %v1206_v2, %v1103_v45  ;;  %v1234_v28 = vld [vmem:[#allocation2 + $0x18] sm:$0xff]  ;;  %v4559_v52 = vpop.f32.mrb[33].mxu1 }
 0x137   : > { %1230 = vst.msk [vmem:[#allocation2 + $0x38] sm:$0xff] %vm483_vm2, %v1222_v44  ;;  %v1372_v50 = vadd.f32 %v4459_v40, %v1234_v28  ;;  %v1233_v31 = vld [vmem:[#allocation2 + $0x10] sm:$0xff]  ;;  %v4563_v54 = vpop.f32.mrb[32].mxu0 }
 0x138   : > { %1229 = vst.msk [vmem:[#allocation2 + $0x30] sm:$0xff] %vm483_vm2, %v1221_v47  ;;  %v1371_v53 = vadd.f32 %v4462_v43, %v1233_v31  ;;  %v4566_v55 = vpop.f32.mrb[33].mxu0 }
 0x139   : > { %1380 = vst.msk [vmem:[#allocation2 + $0x18] sm:$0xff] %vm483_vm2, %v1372_v50  ;;  %v1236_v56 = vld [vmem:[#allocation2 + $0x28] sm:$0xff]  ;;  %v4569_v57 = vpop.f32.mrb[34].mxu1 }
 0x13a   : > { %1379 = vst.msk [vmem:[#allocation2 + $0x10] sm:$0xff] %vm483_vm2, %v1371_v53  ;;  %v1374_v40 = vadd.f32 %v4467_v48, %v1236_v56  ;;  %v1235_v59 = vld [vmem:[#allocation2 + $0x20] sm:$0xff]  ;;  %v4572_v60 = vpop.f32.mrb[35].mxu1 }
 0x13b   : > { %v1373_v62 = vadd.f32 %v4469_v51, %v1235_v59  ;;  %v4575_v43 = vpop.f32.mrb[34].mxu0 }
 0x13c   : > { %v1386_v63 = vld [vmem:[#allocation2 + $0x8] sm:$0xff]  ;;  %1382 = vst.msk [vmem:[#allocation2 + $0x28] sm:$0xff] %vm483_vm2, %v1374_v40  ;;  %v4579_v2 = vpop.f32.mrb[35].mxu0 }
 0x13d   : > { %v1504_v0 = vadd.f32 %v4501_v10, %v1386_v63  ;;  %v1385_v1 = vld [vmem:[#allocation2] sm:$0xff]  ;;  %1381 = vst.msk [vmem:[#allocation2 + $0x20] sm:$0xff] %vm483_vm2, %v1373_v62  ;;  %v4583_v9 = vpop.f32.mrb[36].mxu1 }
 0x13e   : > { %v1503_v8 = vadd.f32 %v4507_v16, %v1385_v1  ;;  %v1238_v48 = vld [vmem:[#allocation2 + $0x38] sm:$0xff]  ;;  %v4587_v12 = vpop.f32.mrb[37].mxu1 }
 0x13f   : > { %1512 = vst.msk [vmem:[#allocation2 + $0x8] sm:$0xff] %vm483_vm2, %v1504_v0  ;;  %v1376_v51 = vadd.f32 %v4483_v58, %v1238_v48  ;;  %v1237_v11 = vld [vmem:[#allocation2 + $0x30] sm:$0xff]  ;;  %v4591_v17 = vpop.f32.mrb[36].mxu0 }
 0x140   : > { %1511 = vst.msk [vmem:[#allocation2] sm:$0xff] %vm483_vm2, %v1503_v8  ;;  %v1375_v10 = vadd.f32 %v4485_v61, %v1237_v11  ;;  %v1388_v13 = vld [vmem:[#allocation2 + $0x18] sm:$0xff]  ;;  %v4595_v15 = vpop.f32.mrb[37].mxu0 }
 0x141   : > { %1384 = vst.msk [vmem:[#allocation2 + $0x38] sm:$0xff] %vm483_vm2, %v1376_v51  ;;  %v1506_v16 = vadd.f32 %v4519_v18, %v1388_v13  ;;  %v1387_v7 = vld [vmem:[#allocation2 + $0x10] sm:$0xff]  ;;  %v4599_v19 = vpop.f32.mrb[38].mxu1 }
 0x142   : > { %1383 = vst.msk [vmem:[#allocation2 + $0x30] sm:$0xff] %vm483_vm2, %v1375_v10  ;;  %v1505_v58 = vadd.f32 %v4525_v22, %v1387_v7  ;;  %v4602_v20 = vpop.f32.mrb[39].mxu1 }
 0x143   : > { %1514 = vst.msk [vmem:[#allocation2 + $0x18] sm:$0xff] %vm483_vm2, %v1506_v16  ;;  %v1390_v61 = vld [vmem:[#allocation2 + $0x28] sm:$0xff]  ;;  %v4605_v21 = vpop.f32.mrb[38].mxu0 }
 0x144   : > { %1513 = vst.msk [vmem:[#allocation2 + $0x10] sm:$0xff] %vm483_vm2, %v1505_v58  ;;  %v1508_v18 = vadd.f32 %v4537_v27, %v1390_v61  ;;  %v1389_v23 = vld [vmem:[#allocation2 + $0x20] sm:$0xff]  ;;  %v4608_v26 = vpop.f32.mrb[39].mxu0 }
 0x145   : > { %v1507_v29 = vadd.f32 %v4539_v32, %v1389_v23  ;;  %v4611_v22 = vpop.f32.mrb[40].mxu1 }
 0x146   : > { %v1520_v30 = vld [vmem:[#allocation2 + $0x8] sm:$0xff]  ;;  %1516 = vst.msk [vmem:[#allocation2 + $0x28] sm:$0xff] %vm483_vm2, %v1508_v18  ;;  %v4615_v36 = vpop.f32.mrb[41].mxu1 }
 0x147   : > { %v1643_v33 = vadd.f32 %v4497_v3, %v1520_v30  ;;  %v1519_v34 = vld [vmem:[#allocation2] sm:$0xff]  ;;  %1515 = vst.msk [vmem:[#allocation2 + $0x20] sm:$0xff] %vm483_vm2, %v1507_v29  ;;  %v4619_v39 = vpop.f32.mrb[40].mxu0 }
 0x148   : > { %v1642_v37 = vadd.f32 %v4499_v5, %v1519_v34  ;;  %v1392_v27 = vld [vmem:[#allocation2 + $0x38] sm:$0xff]  ;;  %v4623_v44 = vpop.f32.mrb[41].mxu0 }
 0x149   : > { %1651 = vst.msk [vmem:[#allocation2 + $0x8] sm:$0xff] %vm483_vm2, %v1643_v33  ;;  %v1510_v32 = vadd.f32 %v4549_v42, %v1392_v27  ;;  %v1391_v41 = vld [vmem:[#allocation2 + $0x30] sm:$0xff]  ;;  %v4627_v47 = vpop.f32.mrb[42].mxu1 }
 0x14a   : > { %1650 = vst.msk [vmem:[#allocation2] sm:$0xff] %vm483_vm2, %v1642_v37  ;;  %v1509_v3 = vadd.f32 %v4552_v46, %v1391_v41  ;;  %v1522_v45 = vld [vmem:[#allocation2 + $0x18] sm:$0xff]  ;;  %v4631_v50 = vpop.f32.mrb[43].mxu1 }
 0x14b   : > { %1518 = vst.msk [vmem:[#allocation2 + $0x38] sm:$0xff] %vm483_vm2, %v1510_v32  ;;  %v1645_v5 = vadd.f32 %v4513_v4, %v1522_v45  ;;  %v1521_v28 = vld [vmem:[#allocation2 + $0x10] sm:$0xff]  ;;  %v4635_v31 = vpop.f32.mrb[42].mxu0 }
 0x14c   : > { %1517 = vst.msk [vmem:[#allocation2 + $0x30] sm:$0xff] %vm483_vm2, %v1509_v3  ;;  %v1644_v42 = vadd.f32 %v4516_v6, %v1521_v28  ;;  %v4638_v46 = vpop.f32.mrb[43].mxu0 }
 0x14d   : > { %1653 = vst.msk [vmem:[#allocation2 + $0x18] sm:$0xff] %vm483_vm2, %v1645_v5  ;;  %v1524_v53 = vld [vmem:[#allocation2 + $0x28] sm:$0xff]  ;;  %v4641_v56 = vpop.f32.mrb[44].mxu1 }
 0x14e   : > { %1652 = vst.msk [vmem:[#allocation2 + $0x10] sm:$0xff] %vm483_vm2, %v1644_v42  ;;  %v1647_v4 = vadd.f32 %v4531_v24, %v1524_v53  ;;  %v1523_v40 = vld [vmem:[#allocation2 + $0x20] sm:$0xff]  ;;  %v4644_v59 = vpop.f32.mrb[45].mxu1 }
 0x14f   : > { %v1646_v62 = vadd.f32 %v4534_v25, %v1523_v40  ;;  %v4647_v63 = vpop.f32.mrb[44].mxu0 }
 0x150   : > { %v1659_v6 = vld [vmem:[#allocation2 + $0x8] sm:$0xff]  ;;  %1655 = vst.msk [vmem:[#allocation2 + $0x28] sm:$0xff] %vm483_vm2, %v1647_v4  ;;  %v4654_v1 = vpop.f32.mrb[45].mxu0 }
 0x151   : > { %3211 = vst.msk [vmem:[%s4472_s18 + $0x48] sm:$0xff] %vm483_vm2, %v1659_v6  ;;  %1676 = vst.msk [vmem:[#allocation2 + $0x8] sm:$0xff] %vm483_vm2, %v3993_v14  ;;  %v1658_v0 = vld [vmem:[#allocation2] sm:$0xff]  ;;  %v4661_v25 = vpop.f32.mrb[46].mxu1 }
 0x152   : > { %1654 = vst.msk [vmem:[#allocation2 + $0x20] sm:$0xff] %vm483_vm2, %v1646_v62  ;;  %v1526_v24 = vld [vmem:[#allocation2 + $0x38] sm:$0xff]  ;;  %3210 = vst.msk [vmem:[%s4472_s18 + $0x40] sm:$0xff] %vm483_vm2, %v1658_v0  ;;  %v4664_v51 = vpop.f32.mrb[47].mxu1 }
 0x153   : > { %1675 = vst.msk [vmem:[#allocation2] sm:$0xff] %vm483_vm2, %v3993_v14  ;;  %v1649_v8 = vadd.f32 %v4541_v35, %v1526_v24  ;;  %v1525_v48 = vld [vmem:[#allocation2 + $0x30] sm:$0xff]  ;;  %v4667_v13 = vpop.f32.mrb[46].mxu0 }
 0x154   : > { %v1648_v11 = vadd.f32 %v4545_v38, %v1525_v48  ;;  %v1661_v10 = vld [vmem:[#allocation2 + $0x18] sm:$0xff]  ;;  %v4674_v7 = vpop.f32.mrb[47].mxu0 }
 0x155   : > { %1657 = vst.msk [vmem:[#allocation2 + $0x38] sm:$0xff] %vm483_vm2, %v1649_v8  ;;  %3213 = vst.msk [vmem:[%s4472_s18 + $0x58] sm:$0xff] %vm483_vm2, %v1661_v10  ;;  %v1660_v16 = vld [vmem:[#allocation2 + $0x10] sm:$0xff]  ;;  %v4681_v35 = vpop.f32.mrb[48].mxu1 }
 0x156   : > { %1678 = vst.msk [vmem:[#allocation2 + $0x18] sm:$0xff] %vm483_vm2, %v3993_v14  ;;  %1656 = vst.msk [vmem:[#allocation2 + $0x30] sm:$0xff] %vm483_vm2, %v1648_v11  ;;  %v4683_v38 = vpop.f32.mrb[49].mxu1 }
 0x157   : > { %3212 = vst.msk [vmem:[%s4472_s18 + $0x50] sm:$0xff] %vm483_vm2, %v1660_v16  ;;  %1677 = vst.msk [vmem:[#allocation2 + $0x10] sm:$0xff] %vm483_vm2, %v3993_v14  ;;  %v1663_v61 = vld [vmem:[#allocation2 + $0x28] sm:$0xff]  ;;  %v4685_v18 = vpop.f32.mrb[48].mxu0 }
 0x158   : > { %v1684_v58 = vld [vmem:[#allocation2 + $0x8] sm:$0xff]  ;;  %3215 = vst.msk [vmem:[%s4472_s18 + $0x68] sm:$0xff] %vm483_vm2, %v1663_v61  ;;  %1680 = vst.msk [vmem:[#allocation2 + $0x28] sm:$0xff] %vm483_vm2, %v3993_v14  ;;  %v4692_v33 = vpop.f32.mrb[49].mxu0 }
 0x159   : > { %v1802_v23 = vadd.f32 %v4563_v54, %v1684_v58  ;;  %v1662_v30 = vld [vmem:[#allocation2 + $0x20] sm:$0xff]  ;;  %v4699_v37 = vpop.f32.mrb[50].mxu1 }
 0x15a   : > { %v1683_v29 = vld [vmem:[#allocation2] sm:$0xff]  ;;  %3214 = vst.msk [vmem:[%s4472_s18 + $0x60] sm:$0xff] %vm483_vm2, %v1662_v30  ;;  %1679 = vst.msk [vmem:[#allocation2 + $0x20] sm:$0xff] %vm483_vm2, %v3993_v14  ;;  %v4702_v54 = vpop.f32.mrb[51].mxu1 }
 0x15b   : > { %v1801_v34 = vadd.f32 %v4566_v55, %v1683_v29  ;;  %1810 = vst.msk [vmem:[#allocation2 + $0x8] sm:$0xff] %vm483_vm2, %v1802_v23  ;;  %v4705_v41 = vpop.f32.mrb[50].mxu0 }
 0x15c   : > { %v1665_v32 = vld [vmem:[#allocation2 + $0x38] sm:$0xff]  ;;  %v4712_v5 = vpop.f32.mrb[51].mxu0 }
 0x15d   : > { %1809 = vst.msk [vmem:[#allocation2] sm:$0xff] %vm483_vm2, %v1801_v34  ;;  %v1686_v27 = vld [vmem:[#allocation2 + $0x18] sm:$0xff]  ;;  %3217 = vst.msk [vmem:[%s4472_s18 + $0x78] sm:$0xff] %vm483_vm2, %v1665_v32  ;;  %v1664_v45 = vld [vmem:[#allocation2 + $0x30] sm:$0xff]  ;;  %v4719_v42 = vpop.f32.mrb[52].mxu1 }
 0x15e   : > { %v1804_v55 = vadd.f32 %v4575_v43, %v1686_v27  ;;  %v1685_v3 = vld [vmem:[#allocation2 + $0x10] sm:$0xff]  ;;  %1682 = vst.msk [vmem:[#allocation2 + $0x38] sm:$0xff] %vm483_vm2, %v3993_v14  ;;  %3216 = vst.msk [vmem:[%s4472_s18 + $0x70] sm:$0xff] %vm483_vm2, %v1664_v45  ;;  %v4722_v43 = vpop.f32.mrb[53].mxu1 }
 0x15f   : > { %v1803_v28 = vadd.f32 %v4579_v2, %v1685_v3  ;;  %1681 = vst.msk [vmem:[#allocation2 + $0x30] sm:$0xff] %vm483_vm2, %v3993_v14  ;;  %v1688_v53 = vld [vmem:[#allocation2 + $0x28] sm:$0xff]  ;;  %v4725_v4 = vpop.f32.mrb[52].mxu0 }
 0x160   : > { %1812 = vst.msk [vmem:[#allocation2 + $0x18] sm:$0xff] %vm483_vm2, %v1804_v55  ;;  %v1806_v40 = vadd.f32 %v4591_v17, %v1688_v53  ;;  %v4728_v2 = vpop.f32.mrb[53].mxu0 }
 0x161   : > { %1811 = vst.msk [vmem:[#allocation2 + $0x10] sm:$0xff] %vm483_vm2, %v1803_v28  ;;  %v1687_v62 = vld [vmem:[#allocation2 + $0x20] sm:$0xff]  ;;  %v4731_v24 = vpop.f32.mrb[54].mxu1 }
 0x162   : > { %v1805_v6 = vadd.f32 %v4595_v15, %v1687_v62  ;;  %v1818_v0 = vld [vmem:[#allocation2 + $0x8] sm:$0xff]  ;;  %1814 = vst.msk [vmem:[#allocation2 + $0x28] sm:$0xff] %vm483_vm2, %v1806_v40  ;;  %v4735_v11 = vpop.f32.mrb[55].mxu1 }
 0x163   : > { %v1936_v8 = vadd.f32 %v4555_v49, %v1818_v0  ;;  %v4739_v16 = vpop.f32.mrb[54].mxu0 }
 0x164   : > { %v1817_v48 = vld [vmem:[#allocation2] sm:$0xff]  ;;  %1813 = vst.msk [vmem:[#allocation2 + $0x20] sm:$0xff] %vm483_vm2, %v1805_v6  ;;  %v4743_v61 = vpop.f32.mrb[55].mxu0 }
 0x165   : > { %v1935_v10 = vadd.f32 %v4559_v52, %v1817_v48  ;;  %v1690_v17 = vld [vmem:[#allocation2 + $0x38] sm:$0xff]  ;;  %1944 = vst.msk [vmem:[#allocation2 + $0x8] sm:$0xff] %vm483_vm2, %v1936_v8  ;;  %v4747_v29 = vpop.f32.mrb[56].mxu1 }
 0x166   : > { %v1808_v15 = vadd.f32 %v4605_v21, %v1690_v17  ;;  %v1689_v58 = vld [vmem:[#allocation2 + $0x30] sm:$0xff]  ;;  %v4751_v34 = vpop.f32.mrb[57].mxu1 }
 0x167   : > { %1943 = vst.msk [vmem:[#allocation2] sm:$0xff] %vm483_vm2, %v1935_v10  ;;  %v1807_v49 = vadd.f32 %v4608_v26, %v1689_v58  ;;  %v1820_v23 = vld [vmem:[#allocation2 + $0x18] sm:$0xff]  ;;  %v4755_v27 = vpop.f32.mrb[56].mxu0 }
 0x168   : > { %1816 = vst.msk [vmem:[#allocation2 + $0x38] sm:$0xff] %vm483_vm2, %v1808_v15  ;;  %v1938_v52 = vadd.f32 %v4569_v57, %v1820_v23  ;;  %v1819_v30 = vld [vmem:[#allocation2 + $0x10] sm:$0xff]  ;;  %v4758_v32 = vpop.f32.mrb[57].mxu0 }
 0x169   : > { %1815 = vst.msk [vmem:[#allocation2 + $0x30] sm:$0xff] %vm483_vm2, %v1807_v49  ;;  %v1937_v21 = vadd.f32 %v4572_v60, %v1819_v30  ;;  %v1822_v26 = vld [vmem:[#allocation2 + $0x28] sm:$0xff]  ;;  %v4761_v55 = vpop.f32.mrb[58].mxu1 }
 0x16a   : > { %1946 = vst.msk [vmem:[#allocation2 + $0x18] sm:$0xff] %vm483_vm2, %v1938_v52  ;;  %v1940_v57 = vadd.f32 %v4583_v9, %v1822_v26  ;;  %v4764_v45 = vpop.f32.mrb[59].mxu1 }
 0x16b   : > { %1945 = vst.msk [vmem:[#allocation2 + $0x10] sm:$0xff] %vm483_vm2, %v1937_v21  ;;  %v1821_v3 = vld [vmem:[#allocation2 + $0x20] sm:$0xff]  ;;  %v4767_v60 = vpop.f32.mrb[58].mxu0 }
 0x16c   : > { %v1939_v28 = vadd.f32 %v4587_v12, %v1821_v3  ;;  %v1952_v53 = vld [vmem:[#allocation2 + $0x8] sm:$0xff]  ;;  %1948 = vst.msk [vmem:[#allocation2 + $0x28] sm:$0xff] %vm483_vm2, %v1940_v57  ;;  %v4771_v6 = vpop.f32.mrb[59].mxu0 }
 0x16d   : > { %v2075_v40 = vadd.f32 %v4619_v39, %v1952_v53  ;;  %v4775_v8 = vpop.f32.mrb[60].mxu1 }
 0x16e   : > { %v1951_v62 = vld [vmem:[#allocation2] sm:$0xff]  ;;  %1947 = vst.msk [vmem:[#allocation2 + $0x20] sm:$0xff] %vm483_vm2, %v1939_v28  ;;  %v4779_v10 = vpop.f32.mrb[61].mxu1 }
 0x16f   : > { %v2074_v0 = vadd.f32 %v4623_v44, %v1951_v62  ;;  %v1824_v9 = vld [vmem:[#allocation2 + $0x38] sm:$0xff]  ;;  %2083 = vst.msk [vmem:[#allocation2 + $0x8] sm:$0xff] %vm483_vm2, %v2075_v40  ;;  %v4783_v15 = vpop.f32.mrb[60].mxu0 }
 0x170   : > { %v1942_v12 = vadd.f32 %v4599_v19, %v1824_v9  ;;  %v1823_v48 = vld [vmem:[#allocation2 + $0x30] sm:$0xff]  ;;  %v4787_v49 = vpop.f32.mrb[61].mxu0 }
 0x171   : > { %2082 = vst.msk [vmem:[#allocation2] sm:$0xff] %vm483_vm2, %v2074_v0  ;;  %v1941_v39 = vadd.f32 %v4602_v20, %v1823_v48  ;;  %v1954_v17 = vld [vmem:[#allocation2 + $0x18] sm:$0xff]  ;;  %v4791_v23 = vpop.f32.mrb[62].mxu1 }
 0x172   : > { %1950 = vst.msk [vmem:[#allocation2 + $0x38] sm:$0xff] %vm483_vm2, %v1942_v12  ;;  %v2077_v44 = vadd.f32 %v4635_v31, %v1954_v17  ;;  %v1953_v58 = vld [vmem:[#allocation2 + $0x10] sm:$0xff]  ;;  %v4794_v52 = vpop.f32.mrb[63].mxu1 }
 0x173   : > { %1949 = vst.msk [vmem:[#allocation2 + $0x30] sm:$0xff] %vm483_vm2, %v1941_v39  ;;  %v2076_v19 = vadd.f32 %v4638_v46, %v1953_v58  ;;  %v1956_v20 = vld [vmem:[#allocation2 + $0x28] sm:$0xff]  ;;  %v4797_v30 = vpop.f32.mrb[62].mxu0 }
 0x174   : > { %2085 = vst.msk [vmem:[#allocation2 + $0x18] sm:$0xff] %vm483_vm2, %v2077_v44  ;;  %v2079_v31 = vadd.f32 %v4647_v63, %v1956_v20  ;;  %v4800_v26 = vpop.f32.mrb[63].mxu0 }
 0x175   : > { %2084 = vst.msk [vmem:[#allocation2 + $0x10] sm:$0xff] %vm483_vm2, %v2076_v19  ;;  %v1955_v21 = vld [vmem:[#allocation2 + $0x20] sm:$0xff] }
 0x176   : > { %v2078_v57 = vadd.f32 %v4654_v1, %v1955_v21  ;;  %v2091_v3 = vld [vmem:[#allocation2 + $0x8] sm:$0xff]  ;;  %2087 = vst.msk [vmem:[#allocation2 + $0x28] sm:$0xff] %vm483_vm2, %v2079_v31 }
 0x177   : > { %v2213_v46 = vadd.f32 %v4611_v22, %v2091_v3 }
 0x178   : > { %v2090_v28 = vld [vmem:[#allocation2] sm:$0xff]  ;;  %2086 = vst.msk [vmem:[#allocation2 + $0x20] sm:$0xff] %vm483_vm2, %v2078_v57 }
 0x179   : > { %v2212_v53 = vadd.f32 %v4615_v36, %v2090_v28  ;;  %v1958_v40 = vld [vmem:[#allocation2 + $0x38] sm:$0xff]  ;;  %2221 = vst.msk [vmem:[#allocation2 + $0x8] sm:$0xff] %vm483_vm2, %v2213_v46 }
 0x17a   : > { %v2081_v63 = vadd.f32 %v4667_v13, %v1958_v40  ;;  %v1957_v62 = vld [vmem:[#allocation2 + $0x30] sm:$0xff] }
 0x17b   : > { %2220 = vst.msk [vmem:[#allocation2] sm:$0xff] %vm483_vm2, %v2212_v53  ;;  %v2080_v1 = vadd.f32 %v4674_v7, %v1957_v62  ;;  %v2093_v0 = vld [vmem:[#allocation2 + $0x18] sm:$0xff] }
 0x17c   : > { %2089 = vst.msk [vmem:[#allocation2 + $0x38] sm:$0xff] %vm483_vm2, %v2081_v63  ;;  %v2215_v22 = vadd.f32 %v4627_v47, %v2093_v0  ;;  %v2092_v9 = vld [vmem:[#allocation2 + $0x10] sm:$0xff] }
 0x17d   : > { %2088 = vst.msk [vmem:[#allocation2 + $0x30] sm:$0xff] %vm483_vm2, %v2080_v1  ;;  %v2214_v36 = vadd.f32 %v4631_v50, %v2092_v9  ;;  %v2095_v13 = vld [vmem:[#allocation2 + $0x28] sm:$0xff] }
 0x17e   : > { %2223 = vst.msk [vmem:[#allocation2 + $0x18] sm:$0xff] %vm483_vm2, %v2215_v22  ;;  %v2217_v12 = vadd.f32 %v4641_v56, %v2095_v13 }
 0x17f   : > { %2222 = vst.msk [vmem:[#allocation2 + $0x10] sm:$0xff] %vm483_vm2, %v2214_v36  ;;  %v2094_v48 = vld [vmem:[#allocation2 + $0x20] sm:$0xff] }
 0x180   : > { %v2216_v7 = vadd.f32 %v4644_v59, %v2094_v48  ;;  %v2229_v39 = vld [vmem:[#allocation2 + $0x8] sm:$0xff]  ;;  %2225 = vst.msk [vmem:[#allocation2 + $0x28] sm:$0xff] %vm483_vm2, %v2217_v12 }
 0x181   : > { %3259 = vst.msk [vmem:[%s4472_s18 + $0x88] sm:$0xff] %vm483_vm2, %v2229_v39  ;;  %2246 = vst.msk [vmem:[#allocation2 + $0x8] sm:$0xff] %vm483_vm2, %v3993_v14 }
 0x182   : > { %v2228_v47 = vld [vmem:[#allocation2] sm:$0xff]  ;;  %2224 = vst.msk [vmem:[#allocation2 + $0x20] sm:$0xff] %vm483_vm2, %v2216_v7 }
 0x183   : > { %v2097_v50 = vld [vmem:[#allocation2 + $0x38] sm:$0xff]  ;;  %3258 = vst.msk [vmem:[%s4472_s18 + $0x80] sm:$0xff] %vm483_vm2, %v2228_v47  ;;  %2245 = vst.msk [vmem:[#allocation2] sm:$0xff] %vm483_vm2, %v3993_v14 }
 0x184   : > { %v2219_v56 = vadd.f32 %v4661_v25, %v2097_v50  ;;  %v2096_v59 = vld [vmem:[#allocation2 + $0x30] sm:$0xff] }
 0x185   : > { %v2218_v17 = vadd.f32 %v4664_v51, %v2096_v59  ;;  %v2231_v44 = vld [vmem:[#allocation2 + $0x18] sm:$0xff] }
 0x186   : > { %2227 = vst.msk [vmem:[#allocation2 + $0x38] sm:$0xff] %vm483_vm2, %v2219_v56  ;;  %3261 = vst.msk [vmem:[%s4472_s18 + $0x98] sm:$0xff] %vm483_vm2, %v2231_v44  ;;  %v2230_v58 = vld [vmem:[#allocation2 + $0x10] sm:$0xff] }
 0x187   : > { %2248 = vst.msk [vmem:[#allocation2 + $0x18] sm:$0xff] %vm483_vm2, %v3993_v14  ;;  %2226 = vst.msk [vmem:[#allocation2 + $0x30] sm:$0xff] %vm483_vm2, %v2218_v17  ;;  %v2233_v51 = vld [vmem:[#allocation2 + $0x28] sm:$0xff] }
 0x188   : > { %3260 = vst.msk [vmem:[%s4472_s18 + $0x90] sm:$0xff] %vm483_vm2, %v2230_v58  ;;  %2247 = vst.msk [vmem:[#allocation2 + $0x10] sm:$0xff] %vm483_vm2, %v3993_v14  ;;  %v2254_v25 = vld [vmem:[#allocation2 + $0x8] sm:$0xff] }
 0x189   : > { %v2372_v19 = vadd.f32 %v4685_v18, %v2254_v25  ;;  %3263 = vst.msk [vmem:[%s4472_s18 + $0xa8] sm:$0xff] %vm483_vm2, %v2233_v51  ;;  %2250 = vst.msk [vmem:[#allocation2 + $0x28] sm:$0xff] %vm483_vm2, %v3993_v14  ;;  %v2232_v31 = vld [vmem:[#allocation2 + $0x20] sm:$0xff] }
 0x18a   : > { %v2253_v20 = vld [vmem:[#allocation2] sm:$0xff]  ;;  %3262 = vst.msk [vmem:[%s4472_s18 + $0xa0] sm:$0xff] %vm483_vm2, %v2232_v31  ;;  %2249 = vst.msk [vmem:[#allocation2 + $0x20] sm:$0xff] %vm483_vm2, %v3993_v14 }
 0x18b   : > { %v2371_v21 = vadd.f32 %v4692_v33, %v2253_v20  ;;  %2380 = vst.msk [vmem:[#allocation2 + $0x8] sm:$0xff] %vm483_vm2, %v2372_v19 }
 0x18d   : > { %2379 = vst.msk [vmem:[#allocation2] sm:$0xff] %vm483_vm2, %v2371_v21  ;;  %v2235_v57 = vld [vmem:[#allocation2 + $0x38] sm:$0xff] }
 0x18e   : > { %v2256_v18 = vld [vmem:[#allocation2 + $0x18] sm:$0xff]  ;;  %3265 = vst.msk [vmem:[%s4472_s18 + $0xb8] sm:$0xff] %vm483_vm2, %v2235_v57  ;;  %2252 = vst.msk [vmem:[#allocation2 + $0x38] sm:$0xff] %vm483_vm2, %v3993_v14  ;;  %v2234_v33 = vld [vmem:[#allocation2 + $0x30] sm:$0xff] }
 0x18f   : > { %v2374_v3 = vadd.f32 %v4705_v41, %v2256_v18  ;;  %v2255_v46 = vld [vmem:[#allocation2 + $0x10] sm:$0xff]  ;;  %3264 = vst.msk [vmem:[%s4472_s18 + $0xb0] sm:$0xff] %vm483_vm2, %v2234_v33  ;;  %2251 = vst.msk [vmem:[#allocation2 + $0x30] sm:$0xff] %vm483_vm2, %v3993_v14 }
 0x190   : > { %v2373_v28 = vadd.f32 %v4712_v5, %v2255_v46  ;;  %v2258_v53 = vld [vmem:[#allocation2 + $0x28] sm:$0xff] }
 0x191   : > { %2382 = vst.msk [vmem:[#allocation2 + $0x18] sm:$0xff] %vm483_vm2, %v2374_v3  ;;  %v2376_v41 = vadd.f32 %v4725_v4, %v2258_v53  ;;  %v2257_v40 = vld [vmem:[#allocation2 + $0x20] sm:$0xff] }
 0x192   : > { %2381 = vst.msk [vmem:[#allocation2 + $0x10] sm:$0xff] %vm483_vm2, %v2373_v28  ;;  %v2375_v63 = vadd.f32 %v4728_v2, %v2257_v40  ;;  %v2388_v62 = vld [vmem:[#allocation2 + $0x8] sm:$0xff]  ;;  %v2918_v40 = vld [vmem:[%s4472_s18 + $0x10] sm:$0xff] (%p3894_p5) }
 0x193   : > { %2384 = vst.msk [vmem:[#allocation2 + $0x28] sm:$0xff] %vm483_vm2, %v2376_v41  ;;  %v2506_v5 = vadd.f32 %v4681_v35, %v2388_v62  ;;  %v2916_v41 = vld [vmem:[%s4472_s18 + $0x8] sm:$0xff] (%p3894_p5)  ;;  %v2922_v62 = vld [vmem:[%s4472_s18 + $0x20] sm:$0xff] (%p3894_p5)  ;;  %2919 = vst [vmem:[%s4953_s10 + $0x10] sm:$0xff] (%p3894_p5), %v2918_v40 }
 0x194   : > { %v2387_v1 = vld [vmem:[#allocation2] sm:$0xff]  ;;  %2383 = vst.msk [vmem:[#allocation2 + $0x20] sm:$0xff] %vm483_vm2, %v2375_v63  ;;  %v2920_v63 = vld [vmem:[%s4472_s18 + $0x18] sm:$0xff] (%p3894_p5)  ;;  %2917 = vst [vmem:[%s4953_s10 + $0x8] sm:$0xff] (%p3894_p5), %v2916_v41 }
 0x195   : > { %v2505_v14 = vadd.f32 %v4683_v38, %v2387_v1  ;;  %v2260_v0 = vld [vmem:[#allocation2 + $0x38] sm:$0xff]  ;;  %2514 = vst.msk [vmem:[#allocation2 + $0x8] sm:$0xff] %vm483_vm2, %v2506_v5  ;;  %v2924_v5 = vld [vmem:[%s4472_s18 + $0x28] sm:$0xff] (%p3894_p5)  ;;  %v2926_v1 = vld [vmem:[%s4472_s18 + $0x30] sm:$0xff] (%p3894_p5) }
 0x196   : > { %v2378_v22 = vadd.f32 %v4739_v16, %v2260_v0  ;;  %v2259_v9 = vld [vmem:[#allocation2 + $0x30] sm:$0xff]  ;;  %v2930_v0 = vld [vmem:[%s4472_s18 + $0x40] sm:$0xff] (%p3894_p5)  ;;  %2921 = vst [vmem:[%s4953_s10 + $0x18] sm:$0xff] (%p3894_p5), %v2920_v63  ;;  %2923 = vst [vmem:[%s4953_s10 + $0x20] sm:$0xff] (%p3894_p5), %v2922_v62 }
 0x197   : > { %2513 = vst.msk [vmem:[#allocation2] sm:$0xff] %vm483_vm2, %v2505_v14  ;;  %v2377_v4 = vadd.f32 %v4743_v61, %v2259_v9  ;;  %v2928_v14 = vld [vmem:[%s4472_s18 + $0x38] sm:$0xff] (%p3894_p5)  ;;  %v2934_v9 = vld [vmem:[%s4472_s18 + $0x50] sm:$0xff] (%p3894_p5)  ;;  %2925 = vst [vmem:[%s4953_s10 + $0x28] sm:$0xff] (%p3894_p5), %v2924_v5 }
 0x198   : > { %v2390_v2 = vld [vmem:[#allocation2 + $0x18] sm:$0xff]  ;;  %2386 = vst.msk [vmem:[#allocation2 + $0x38] sm:$0xff] %vm483_vm2, %v2378_v22  ;;  %v2932_v22 = vld [vmem:[%s4472_s18 + $0x48] sm:$0xff] (%p3894_p5)  ;;  %2927 = vst [vmem:[%s4953_s10 + $0x30] sm:$0xff] (%p3894_p5), %v2926_v1 }
 0x199   : > { %v2508_v35 = vadd.f32 %v4699_v37, %v2390_v2  ;;  %v2389_v36 = vld [vmem:[#allocation2 + $0x10] sm:$0xff]  ;;  %2385 = vst.msk [vmem:[#allocation2 + $0x30] sm:$0xff] %vm483_vm2, %v2377_v4  ;;  %v2936_v4 = vld [vmem:[%s4472_s18 + $0x58] sm:$0xff] (%p3894_p5)  ;;  %2929 = vst [vmem:[%s4953_s10 + $0x38] sm:$0xff] (%p3894_p5), %v2928_v14 }
 0x19a   : > { %v2507_v38 = vadd.f32 %v4702_v54, %v2389_v36  ;;  %v2392_v16 = vld [vmem:[#allocation2 + $0x28] sm:$0xff]  ;;  %2931 = vst [vmem:[%s4953_s10 + $0x100] sm:$0xff] (%p3894_p5), %v2930_v0  ;;  %2933 = vst [vmem:[%s4953_s10 + $0x108] sm:$0xff] (%p3894_p5), %v2932_v22  ;;  %v2938_v2 = vld [vmem:[%s4472_s18 + $0x60] sm:$0xff] (%p3894_p5) }
 0x19b   : > { %2516 = vst.msk [vmem:[#allocation2 + $0x18] sm:$0xff] %vm483_vm2, %v2508_v35  ;;  %v2510_v13 = vadd.f32 %v4719_v42, %v2392_v16  ;;  %v2391_v12 = vld [vmem:[#allocation2 + $0x20] sm:$0xff]  ;;  %2935 = vst [vmem:[%s4953_s10 + $0x110] sm:$0xff] (%p3894_p5), %v2934_v9  ;;  %v2940_v35 = vld [vmem:[%s4472_s18 + $0x68] sm:$0xff] (%p3894_p5) }
 0x19c   : > { %2515 = vst.msk [vmem:[#allocation2 + $0x10] sm:$0xff] %vm483_vm2, %v2507_v38  ;;  %v2509_v61 = vadd.f32 %v4722_v43, %v2391_v12  ;;  %v2522_v48 = vld [vmem:[#allocation2 + $0x8] sm:$0xff]  ;;  %2937 = vst [vmem:[%s4953_s10 + $0x118] sm:$0xff] (%p3894_p5), %v2936_v4  ;;  %v2942_v36 = vld [vmem:[%s4472_s18 + $0x70] sm:$0xff] (%p3894_p5) }
 0x19d   : > { %2518 = vst.msk [vmem:[#allocation2 + $0x28] sm:$0xff] %vm483_vm2, %v2510_v13  ;;  %v2640_v37 = vadd.f32 %v4755_v27, %v2522_v48  ;;  %2939 = vst [vmem:[%s4953_s10 + $0x120] sm:$0xff] (%p3894_p5), %v2938_v2  ;;  %v2944_v38 = vld [vmem:[%s4472_s18 + $0x78] sm:$0xff] (%p3894_p5)  ;;  %v2946_v16 = vld [vmem:[%s4472_s18 + $0x80] sm:$0xff] (%p3894_p5) }
 0x19e   : > { %v2521_v7 = vld [vmem:[#allocation2] sm:$0xff]  ;;  %2517 = vst.msk [vmem:[#allocation2 + $0x20] sm:$0xff] %vm483_vm2, %v2509_v61  ;;  %2941 = vst [vmem:[%s4953_s10 + $0x128] sm:$0xff] (%p3894_p5), %v2940_v35  ;;  %v2948_v13 = vld [vmem:[%s4472_s18 + $0x88] sm:$0xff] (%p3894_p5) }
 0x19f   : > { %v2639_v54 = vadd.f32 %v4758_v32, %v2521_v7  ;;  %v2394_v39 = vld [vmem:[#allocation2 + $0x38] sm:$0xff]  ;;  %2648 = vst.msk [vmem:[#allocation2 + $0x8] sm:$0xff] %vm483_vm2, %v2640_v37  ;;  %2943 = vst [vmem:[%s4953_s10 + $0x130] sm:$0xff] (%p3894_p5), %v2942_v36  ;;  %v2950_v12 = vld [vmem:[%s4472_s18 + $0x90] sm:$0xff] (%p3894_p5) }
 0x1a0   : > { %v2512_v47 = vadd.f32 %v4731_v24, %v2394_v39  ;;  %v2393_v50 = vld [vmem:[#allocation2 + $0x30] sm:$0xff]  ;;  %2945 = vst [vmem:[%s4953_s10 + $0x138] sm:$0xff] (%p3894_p5), %v2944_v38  ;;  %2947 = vst [vmem:[%s4953_s10 + $0x200] sm:$0xff] (%p3894_p5), %v2946_v16  ;;  %v2952_v61 = vld [vmem:[%s4472_s18 + $0x98] sm:$0xff] (%p3894_p5) }
 0x1a1   : > { %2647 = vst.msk [vmem:[#allocation2] sm:$0xff] %vm483_vm2, %v2639_v54  ;;  %v2511_v42 = vadd.f32 %v4735_v11, %v2393_v50  ;;  %2949 = vst [vmem:[%s4953_s10 + $0x208] sm:$0xff] (%p3894_p5), %v2948_v13  ;;  %v2954_v48 = vld [vmem:[%s4472_s18 + $0xa0] sm:$0xff] (%p3894_p5)  ;;  %v2956_v37 = vld [vmem:[%s4472_s18 + $0xa8] sm:$0xff] (%p3894_p5) }
 0x1a2   : > { %v2524_v43 = vld [vmem:[#allocation2 + $0x18] sm:$0xff]  ;;  %2520 = vst.msk [vmem:[#allocation2 + $0x38] sm:$0xff] %vm483_vm2, %v2512_v47  ;;  %2951 = vst [vmem:[%s4953_s10 + $0x210] sm:$0xff] (%p3894_p5), %v2950_v12  ;;  %v2958_v7 = vld [vmem:[%s4472_s18 + $0xb0] sm:$0xff] (%p3894_p5) }
 0x1a3   : > { %v2642_v27 = vadd.f32 %v4767_v60, %v2524_v43  ;;  %v2523_v56 = vld [vmem:[#allocation2 + $0x10] sm:$0xff]  ;;  %2519 = vst.msk [vmem:[#allocation2 + $0x30] sm:$0xff] %vm483_vm2, %v2511_v42  ;;  %2953 = vst [vmem:[%s4953_s10 + $0x218] sm:$0xff] (%p3894_p5), %v2952_v61  ;;  %v2960_v54 = vld [vmem:[%s4472_s18 + $0xb8] sm:$0xff] (%p3894_p5) }
 0x1a4   : > { %v2641_v32 = vadd.f32 %v4771_v6, %v2523_v56  ;;  %v2526_v24 = vld [vmem:[#allocation2 + $0x28] sm:$0xff]  ;;  %2955 = vst [vmem:[%s4953_s10 + $0x220] sm:$0xff] (%p3894_p5), %v2954_v48  ;;  %2957 = vst [vmem:[%s4953_s10 + $0x228] sm:$0xff] (%p3894_p5), %v2956_v37 }
 0x1a5   : > { %2650 = vst.msk [vmem:[#allocation2 + $0x18] sm:$0xff] %vm483_vm2, %v2642_v27  ;;  %v2644_v59 = vadd.f32 %v4783_v15, %v2526_v24  ;;  %v2525_v17 = vld [vmem:[#allocation2 + $0x20] sm:$0xff]  ;;  %2959 = vst [vmem:[%s4953_s10 + $0x230] sm:$0xff] (%p3894_p5), %v2958_v7 }
 0x1a6   : > { %2649 = vst.msk [vmem:[#allocation2 + $0x10] sm:$0xff] %vm483_vm2, %v2641_v32  ;;  %v2643_v11 = vadd.f32 %v4787_v49, %v2525_v17  ;;  %v2656_v44 = vld [vmem:[#allocation2 + $0x8] sm:$0xff]  ;;  %2961 = vst [vmem:[%s4953_s10 + $0x238] sm:$0xff] (%p3894_p5), %v2960_v54 }
 0x1a7   : > { %2652 = vst.msk [vmem:[#allocation2 + $0x28] sm:$0xff] %vm483_vm2, %v2644_v59  ;;  %v2779_v60 = vadd.f32 %v4747_v29, %v2656_v44 }
 0x1a8   : > { %v2655_v58 = vld [vmem:[#allocation2] sm:$0xff]  ;;  %2651 = vst.msk [vmem:[#allocation2 + $0x20] sm:$0xff] %vm483_vm2, %v2643_v11 }
 0x1a9   : > { %v2778_v6 = vadd.f32 %v4751_v34, %v2655_v58  ;;  %v2528_v25 = vld [vmem:[#allocation2 + $0x38] sm:$0xff]  ;;  %2787 = vst.msk [vmem:[#allocation2 + $0x8] sm:$0xff] %vm483_vm2, %v2779_v60 }
 0x1aa   : > { %v2646_v51 = vadd.f32 %v4797_v30, %v2528_v25  ;;  %v2527_v19 = vld [vmem:[#allocation2 + $0x30] sm:$0xff] }
 0x1ab   : > { %2786 = vst.msk [vmem:[#allocation2] sm:$0xff] %vm483_vm2, %v2778_v6  ;;  %v2645_v15 = vadd.f32 %v4800_v26, %v2527_v19 }
 0x1ac   : > { %v2658_v49 = vld [vmem:[#allocation2 + $0x18] sm:$0xff]  ;;  %2654 = vst.msk [vmem:[#allocation2 + $0x38] sm:$0xff] %vm483_vm2, %v2646_v51 }
 0x1ad   : > { %v2781_v29 = vadd.f32 %v4761_v55, %v2658_v49  ;;  %v2657_v20 = vld [vmem:[#allocation2 + $0x10] sm:$0xff]  ;;  %2653 = vst.msk [vmem:[#allocation2 + $0x30] sm:$0xff] %vm483_vm2, %v2645_v15 }
 0x1ae   : > { %v2780_v34 = vadd.f32 %v4764_v45, %v2657_v20  ;;  %v2660_v30 = vld [vmem:[#allocation2 + $0x28] sm:$0xff] }
 0x1af   : > { %2789 = vst.msk [vmem:[#allocation2 + $0x18] sm:$0xff] %vm483_vm2, %v2781_v29  ;;  %v2783_v31 = vadd.f32 %v4775_v8, %v2660_v30  ;;  %v2659_v26 = vld [vmem:[#allocation2 + $0x20] sm:$0xff] }
 0x1b0   : > { %2788 = vst.msk [vmem:[#allocation2 + $0x10] sm:$0xff] %vm483_vm2, %v2780_v34  ;;  %v2795_v21 = vld [vmem:[#allocation2 + $0x8] sm:$0xff]  ;;  %v2782_v18 = vadd.f32 %v4779_v10, %v2659_v26 }
 0x1b1   : > { %3307 = vst.msk [vmem:[%s4472_s18 + $0xc8] sm:$0xff] %vm483_vm2, %v2795_v21  ;;  %2791 = vst.msk [vmem:[#allocation2 + $0x28] sm:$0xff] %vm483_vm2, %v2783_v31 }
 0x1b2   : > { %v2794_v55 = vld [vmem:[#allocation2] sm:$0xff]  ;;  %2790 = vst.msk [vmem:[#allocation2 + $0x20] sm:$0xff] %vm483_vm2, %v2782_v18 }
 0x1b3   : > { %3306 = vst.msk [vmem:[%s4472_s18 + $0xc0] sm:$0xff] %vm483_vm2, %v2794_v55  ;;  %v2662_v45 = vld [vmem:[#allocation2 + $0x38] sm:$0xff] }
 0x1b4   : > { %v2785_v8 = vadd.f32 %v4791_v23, %v2662_v45  ;;  %v2661_v57 = vld [vmem:[#allocation2 + $0x30] sm:$0xff] }
 0x1b5   : > { %v2784_v10 = vadd.f32 %v4794_v52, %v2661_v57  ;;  %v2914_v52 = vld [vmem:[%s4472_s18] sm:$0xff] (%p3894_p5) }
 0x1b6   : > { %v2797_v3 = vld [vmem:[#allocation2 + $0x18] sm:$0xff]  ;;  %2793 = vst.msk [vmem:[#allocation2 + $0x38] sm:$0xff] %vm483_vm2, %v2785_v8  ;;  %2915 = vst [vmem:[%s4953_s10] sm:$0xff] (%p3894_p5), %v2914_v52 }
 0x1b7   : > { %3309 = vst.msk [vmem:[%s4472_s18 + $0xd8] sm:$0xff] %vm483_vm2, %v2797_v3  ;;  %v2796_v46 = vld [vmem:[#allocation2 + $0x10] sm:$0xff]  ;;  %2792 = vst.msk [vmem:[#allocation2 + $0x30] sm:$0xff] %vm483_vm2, %v2784_v10 }
 0x1b8   : > { %3308 = vst.msk [vmem:[%s4472_s18 + $0xd0] sm:$0xff] %vm483_vm2, %v2796_v46  ;;  %v2799_v33 = vld [vmem:[#allocation2 + $0x28] sm:$0xff] }
 0x1b9   : > { %3311 = vst.msk [vmem:[%s4472_s18 + $0xe8] sm:$0xff] %vm483_vm2, %v2799_v33  ;;  %v2798_v28 = vld [vmem:[#allocation2 + $0x20] sm:$0xff]  ;;  %2817 = sbr.rel (!%p3894_p5) target bundleno = 456 (0x1c8), region = 44  ;;  %v2964_v47 = vld [vmem:[%s4472_s18 + $0xc8] sm:$0xff] (%p3894_p5) }
 0x1ba   : > { %3310 = vst.msk [vmem:[%s4472_s18 + $0xe0] sm:$0xff] %vm483_vm2, %v2798_v28  ;;  %v2962_v39 = vld [vmem:[%s4472_s18 + $0xc0] sm:$0xff] (%p3894_p5)  ;;  %2965 = vst [vmem:[%s4953_s10 + $0x308] sm:$0xff] (%p3894_p5), %v2964_v47 }
 0x1bb   : > { %2963 = vst [vmem:[%s4953_s10 + $0x300] sm:$0xff] (%p3894_p5), %v2962_v39 }
 0x1bd   : > { %v2801_v23 = vld [vmem:[#allocation2 + $0x38] sm:$0xff] }
 0x1be   : > { %3313 = vst.msk [vmem:[%s4472_s18 + $0xf8] sm:$0xff] %vm483_vm2, %v2801_v23  ;;  %v2800_v53 = vld [vmem:[#allocation2 + $0x30] sm:$0xff]  ;;  %v2968_v42 = vld [vmem:[%s4472_s18 + $0xd8] sm:$0xff] (%p3894_p5) }
 0x1bf   : > { %3312 = vst.msk [vmem:[%s4472_s18 + $0xf0] sm:$0xff] %vm483_vm2, %v2800_v53  ;;  %v2966_v50 = vld [vmem:[%s4472_s18 + $0xd0] sm:$0xff] (%p3894_p5)  ;;  %2969 = vst [vmem:[%s4953_s10 + $0x318] sm:$0xff] (%p3894_p5), %v2968_v42 }
 0x1c0   : > { %2967 = vst [vmem:[%s4953_s10 + $0x310] sm:$0xff] %v2966_v50  ;;  %v2972_v27 = vld [vmem:[%s4472_s18 + $0xe8] sm:$0xff] }
 0x1c1   : > { %v2970_v43 = vld [vmem:[%s4472_s18 + $0xe0] sm:$0xff]  ;;  %2973 = vst [vmem:[%s4953_s10 + $0x328] sm:$0xff] %v2972_v27 }
 0x1c2   : > { %2971 = vst [vmem:[%s4953_s10 + $0x320] sm:$0xff] %v2970_v43 }
 0x1c5   : > { %v2976_v32 = vld [vmem:[%s4472_s18 + $0xf8] sm:$0xff] }
 0x1c6   : > { %v2974_v56 = vld [vmem:[%s4472_s18 + $0xf0] sm:$0xff]  ;;  %2977 = vst [vmem:[%s4953_s10 + $0x338] sm:$0xff] %v2976_v32 }
 0x1c7   : > { %2975 = vst [vmem:[%s4953_s10 + $0x330] sm:$0xff] %v2974_v56 }
 0x1c8 PF: > { %s15_s24 = sadd.s32 1, %s3816_s24   ;;  %s5039_s18 = smov %s3796_s19 }
 0x1c9   : > { %p12_p2 = scmp.ge.s32.totalorder %s15_s24, 10   ;;  %s5040_s19 = smov %s3905_s8 }
 0x1ca   : > { %s5041_s20 = smov %s3808_s22  ;;  %s5042_s21 = smov %s3812_s23 }
 0x1cb   : > { %s5043_s22 = smov %s5046_s25  ;;  %s5044_s23 = smov %s5050_s26 }
 0x1cc   :  { %14 = sbr.rel (!%p12_p2) target bundleno = 4 (0x4), region = 132 }

</bundles_post_ra>
